<compile_context>
chip_gen: v5e
topology: v5e:2x2
jax: 0.10.0
libtpu: 0.0.40
codegen_flags: <defaults>
</compile_context>

<pallas_src>
import functools

import jax
import jax.numpy as jnp
from jax.experimental import pallas as pl
from jax.experimental.pallas import tpu as pltpu

LANE = 128
EPS = 1e-5
_SQRT_2_OVER_PI = 0.7978845608028654


def _round_up(n, m):
    return ((n + m - 1) // m) * m


# -----------------------------------------------------------------------------
# Kernel: fused conv(3x3, valid) + folded-BN bias + activation
# -----------------------------------------------------------------------------

def _make_kernel(ksize, activation):
    def kernel(x_ref, w_ref, b_ref, o_ref):
        bblk, h, w, cin = x_ref.shape
        ho = h - ksize + 1
        wo = w - ksize + 1

        # Hoisted single bf16 cast (MXU operand); accumulation stays f32.
        x = x_ref[...].astype(jnp.bfloat16)

        # K-stacked im2col: concatenate the k*k shifted taps along the channel axis and do
        # ONE MXU dot with K = k*k*cin (fills the MXU K dimension, accumulation in the MXU).
        taps = []
        for kh in range(ksize):
            for kw in range(ksize):
                taps.append(x[:, kh:kh + ho, kw:kw + wo, :])
        lhs = jnp.concatenate(taps, axis=-1).reshape(bblk * ho * wo, ksize * ksize * cin)

        acc = jnp.dot(lhs, w_ref[...], preferred_element_type=jnp.float32)  # (M, Cout_p) f32
        y = acc + b_ref[...]                                                # folded BN bias

        if activation == "gelu":
            # torch.nn.GELU(approximate='tanh'); tanh goes to the EUP slot.
            y = 0.5 * y * (1.0 + jnp.tanh(_SQRT_2_OVER_PI * (y + 0.044715 * y * y * y)))
        else:
            y = jnp.maximum(y, 0.0)

        o_ref[...] = y.reshape(bblk, ho, wo, y.shape[-1])

    return kernel


# -----------------------------------------------------------------------------
# Wrapper
# -----------------------------------------------------------------------------

@functools.partial(
    jax.jit,
    static_argnames=("ksize", "activation", "padding", "out_channels", "block_batch"),
)
def conv_bn_act(x_nchw, w_stacked, bias, *, ksize, activation, padding,
                out_channels, block_batch=1):
    """x_nchw: (N, Cin, H, W) f32 (PyTorch layout). Returns (N, Cout, HO, WO) f32."""
    x = jnp.transpose(x_nchw, (0, 2, 3, 1))                    # NCHW -> NHWC
    if padding:
        x = jnp.pad(x, ((0, 0), (padding, padding), (padding, padding), (0, 0)))
    n, h, w, cin = x.shape
    ho, wo = h - ksize + 1, w - ksize + 1
    cout_p = w_stacked.shape[1]

    # Batch blocking: block_batch images folded into the matmul M dim per grid step.
    n_pad = _round_up(n, block_batch)
    if n_pad != n:
        x = jnp.pad(x, ((0, n_pad - n), (0, 0), (0, 0), (0, 0)))
    grid = (n_pad // block_batch,)

    def resident(arr):
        # Constant index map -> the block stays VMEM-resident across the grid.
        idx = (0,) * arr.ndim
        return pl.BlockSpec(arr.shape, lambda i, _idx=idx: _idx)

    out = pl.pallas_call(
        _make_kernel(ksize, activation),
        grid=grid,
        out_shape=jax.ShapeDtypeStruct((n_pad, ho, wo, cout_p), jnp.float32),
        in_specs=[
            pl.BlockSpec((block_batch, h, w, cin), lambda i: (i, 0, 0, 0)),
            resident(w_stacked),
            resident(bias),
        ],
        out_specs=pl.BlockSpec((block_batch, ho, wo, cout_p), lambda i: (i, 0, 0, 0)),
        compiler_params=pltpu.CompilerParams(
            dimension_semantics=("parallel",),       # shard batch blocks over v7x's 2 TCs
            vmem_limit_bytes=32 * 1024 * 1024,       # tiny kernel; safe on v5e/v6e/v7x
        ),
    )(x, w_stacked, bias)

    out = out[:n, :, :, :out_channels]               # drop batch/channel padding
    return jnp.transpose(out, (0, 3, 1, 2))          # NHWC -> NCHW (match PyTorch)


# -----------------------------------------------------------------------------
# Deterministic synthetic parameters (BN folded, channel-padded, bf16 at init)
# -----------------------------------------------------------------------------

def init_params(key, in_channels, out_channels, ksize=3):
    kw_, kg, kb, km, kv = jax.random.split(key, 5)
    fan_in = in_channels * ksize * ksize
    w = jax.random.normal(kw_, (out_channels, in_channels, ksize, ksize), jnp.float32)
    w = w * (2.0 / fan_in) ** 0.5
    gamma = 1.0 + 0.1 * jax.random.normal(kg, (out_channels,), jnp.float32)
    beta = 0.1 * jax.random.normal(kb, (out_channels,), jnp.float32)
    run_mean = 0.1 * jax.random.normal(km, (out_channels,), jnp.float32)
    run_var = 1.0 + 0.1 * jax.random.uniform(kv, (out_channels,), jnp.float32)

    # Fold eval-mode BatchNorm: scale into the conv weights, bias kept separately.
    scale = gamma / jnp.sqrt(run_var + EPS)
    bias = beta - run_mean * scale
    w_f = w * scale[:, None, None, None]

    # (Cout, Cin, Kh, Kw) -> (Kh, Kw, Cin, Cout) -> (K*K*Cin, Cout): matches the in-kernel
    # im2col tap order (kh outer, kw inner, cin fastest).
    w_kkc = jnp.transpose(w_f, (2, 3, 1, 0)).reshape(ksize * ksize * in_channels, out_channels)
    cout_p = _round_up(out_channels, LANE)
    w_pad = jnp.zeros((ksize * ksize * in_channels, cout_p), jnp.float32)
    w_pad = w_pad.at[:, :out_channels].set(w_kkc)
    b_pad = jnp.zeros((1, cout_p), jnp.float32).at[0, :out_channels].set(bias)

    raw = dict(w=w, gamma=gamma, beta=beta, run_mean=run_mean, run_var=run_var)
    return w_pad.astype(jnp.bfloat16), b_pad, raw


# -----------------------------------------------------------------------------
# Pure-JAX reference (for in-script correctness check)
# -----------------------------------------------------------------------------

def reference_conv_bn_act(x_nchw, raw, activation):
    y = jax.lax.conv_general_dilated(
        x_nchw, raw["w"], window_strides=(1, 1), padding="VALID",
        dimension_numbers=("NCHW", "OIHW", "NCHW"))
    scale = raw["gamma"] / jnp.sqrt(raw["run_var"] + EPS)
    shift = raw["beta"] - raw["run_mean"] * scale
    y = y * scale[None, :, None, None] + shift[None, :, None, None]
    if activation == "gelu":
        y = 0.5 * y * (1.0 + jnp.tanh(_SQRT_2_OVER_PI * (y + 0.044715 * y * y * y)))
    else:
        y = jnp.maximum(y, 0.0)
    return y


# -----------------------------------------------------------------------------
# Main
# -----------------------------------------------------------------------------

if __name__ == "__main__":
    key = jax.random.PRNGKey(0)
    k_param, k_x = jax.random.split(key)

    N, CIN, COUT, H, W, KSIZE = 2, 4, 32, 16, 16, 3
    w_stacked, b_pad, raw = init_params(k_param, CIN, COUT, KSIZE)
    x = jax.random.normal(k_x, (N, CIN, H, W), jnp.float32)

    out = conv_bn_act(x, w_stacked, b_pad, ksize=KSIZE, activation="gelu",
                      padding=0, out_channels=COUT, block_batch=1)
    out = jax.block_until_ready(out)

    assert out.shape == (N, COUT, H - KSIZE + 1, W - KSIZE + 1), out.shape
    assert bool(jnp.all(jnp.isfinite(out)))

    ref = reference_conv_bn_act(x, raw, "gelu")
    assert bool(jnp.allclose(out, ref, atol=5e-2, rtol=5e-2)), float(jnp.abs(out - ref).max())

    print("KERNEL_OK")
</pallas_src>

<mosaic_0001>
module attributes {stable_mosaic.version = 11 : i64} {
  func.func @kernel(%arg0: i32, %arg1: memref<1x16x16x4xf32, #tpu.memory_space<vmem>>, %arg2: memref<36x128xbf16, #tpu.memory_space<vmem>>, %arg3: memref<1x128xf32, #tpu.memory_space<vmem>>, %arg4: memref<1x14x14x128xf32, #tpu.memory_space<vmem>>) attributes {dimension_semantics = [#tpu.dimension_semantics<parallel>], iteration_bounds = array<i64: 2>, scalar_prefetch = 0 : i64, scratch_operands = 0 : i64, tpu.core_type = #tpu.core_type<tc>, window_params = [{transform_indices = @transform_0, window_bounds = array<i64: 1, 16, 16, 4>}, {pipeline_mode = #tpu.pipeline_mode<synchronous>, transform_indices = @transform_1, window_bounds = array<i64: 36, 128>}, {pipeline_mode = #tpu.pipeline_mode<synchronous>, transform_indices = @transform_2, window_bounds = array<i64: 1, 128>}, {transform_indices = @transform_3, window_bounds = array<i64: 1, 14, 14, 128>}]} {
    %c0 = arith.constant 0 : index
    %c0_0 = arith.constant 0 : index
    %c0_1 = arith.constant 0 : index
    %c0_2 = arith.constant 0 : index
    %0 = vector.load %arg1[%c0, %c0_0, %c0_1, %c0_2] : memref<1x16x16x4xf32, #tpu.memory_space<vmem>>, vector<1x16x16x4xf32>
    %1 = arith.truncf %0 : vector<1x16x16x4xf32> to vector<1x16x16x4xbf16>
    %2 = vector.extract_strided_slice %1 {offsets = [0, 0, 0, 0], sizes = [1, 14, 14, 4], strides = [1, 1, 1, 1]} : vector<1x16x16x4xbf16> to vector<1x14x14x4xbf16>
    %3 = vector.extract_strided_slice %1 {offsets = [0, 0, 1, 0], sizes = [1, 14, 14, 4], strides = [1, 1, 1, 1]} : vector<1x16x16x4xbf16> to vector<1x14x14x4xbf16>
    %4 = vector.extract_strided_slice %1 {offsets = [0, 0, 2, 0], sizes = [1, 14, 14, 4], strides = [1, 1, 1, 1]} : vector<1x16x16x4xbf16> to vector<1x14x14x4xbf16>
    %5 = vector.extract_strided_slice %1 {offsets = [0, 1, 0, 0], sizes = [1, 14, 14, 4], strides = [1, 1, 1, 1]} : vector<1x16x16x4xbf16> to vector<1x14x14x4xbf16>
    %6 = vector.extract_strided_slice %1 {offsets = [0, 1, 1, 0], sizes = [1, 14, 14, 4], strides = [1, 1, 1, 1]} : vector<1x16x16x4xbf16> to vector<1x14x14x4xbf16>
    %7 = vector.extract_strided_slice %1 {offsets = [0, 1, 2, 0], sizes = [1, 14, 14, 4], strides = [1, 1, 1, 1]} : vector<1x16x16x4xbf16> to vector<1x14x14x4xbf16>
    %8 = vector.extract_strided_slice %1 {offsets = [0, 2, 0, 0], sizes = [1, 14, 14, 4], strides = [1, 1, 1, 1]} : vector<1x16x16x4xbf16> to vector<1x14x14x4xbf16>
    %9 = vector.extract_strided_slice %1 {offsets = [0, 2, 1, 0], sizes = [1, 14, 14, 4], strides = [1, 1, 1, 1]} : vector<1x16x16x4xbf16> to vector<1x14x14x4xbf16>
    %10 = vector.extract_strided_slice %1 {offsets = [0, 2, 2, 0], sizes = [1, 14, 14, 4], strides = [1, 1, 1, 1]} : vector<1x16x16x4xbf16> to vector<1x14x14x4xbf16>
    %11 = tpu.concatenate %2, %3, %4, %5, %6, %7, %8, %9, %10 in 3 : vector<1x14x14x4xbf16>, vector<1x14x14x4xbf16>, vector<1x14x14x4xbf16>, vector<1x14x14x4xbf16>, vector<1x14x14x4xbf16>, vector<1x14x14x4xbf16>, vector<1x14x14x4xbf16>, vector<1x14x14x4xbf16>, vector<1x14x14x4xbf16> -> vector<1x14x14x36xbf16>
    %12 = vector.shape_cast %11 : vector<1x14x14x36xbf16> to vector<196x36xbf16>
    %c0_3 = arith.constant 0 : index
    %c0_4 = arith.constant 0 : index
    %13 = vector.load %arg2[%c0_3, %c0_4] : memref<36x128xbf16, #tpu.memory_space<vmem>>, vector<36x128xbf16>
    %cst = arith.constant dense<0.000000e+00> : vector<196x128xf32>
    %14 = tpu.matmul %12, %13, %cst {dimension_numbers = #tpu.dot_dimension_numbers<[1], [0], [0], [1], [0, 0, 1, 1], [], []>} : vector<196x36xbf16>, vector<36x128xbf16>, vector<196x128xf32> -> vector<196x128xf32>
    %c0_5 = arith.constant 0 : index
    %c0_6 = arith.constant 0 : index
    %15 = vector.load %arg3[%c0_5, %c0_6] : memref<1x128xf32, #tpu.memory_space<vmem>>, vector<1x128xf32>
    %16 = vector.broadcast %15 : vector<1x128xf32> to vector<196x128xf32>
    %17 = arith.addf %14, %16 : vector<196x128xf32>
    %cst_7 = arith.constant 5.000000e-01 : f32
    %18 = vector.broadcast %cst_7 : f32 to vector<196x128xf32>
    %19 = arith.mulf %18, %17 : vector<196x128xf32>
    %cst_8 = arith.constant 4.471500e-02 : f32
    %20 = vector.broadcast %cst_8 : f32 to vector<196x128xf32>
    %21 = arith.mulf %20, %17 : vector<196x128xf32>
    %22 = arith.mulf %21, %17 : vector<196x128xf32>
    %23 = arith.mulf %22, %17 : vector<196x128xf32>
    %24 = arith.addf %17, %23 : vector<196x128xf32>
    %cst_9 = arith.constant 0.797884583 : f32
    %25 = vector.broadcast %cst_9 : f32 to vector<196x128xf32>
    %26 = arith.mulf %25, %24 : vector<196x128xf32>
    %27 = math.tanh %26 : vector<196x128xf32>
    %cst_10 = arith.constant 1.000000e+00 : f32
    %28 = vector.broadcast %cst_10 : f32 to vector<196x128xf32>
    %29 = arith.addf %28, %27 : vector<196x128xf32>
    %30 = arith.mulf %19, %29 : vector<196x128xf32>
    %31 = vector.shape_cast %30 : vector<196x128xf32> to vector<1x14x14x128xf32>
    %c0_11 = arith.constant 0 : index
    %c0_12 = arith.constant 0 : index
    %c0_13 = arith.constant 0 : index
    %c0_14 = arith.constant 0 : index
    %32 = vector.load %arg4[%c0_11, %c0_12, %c0_13, %c0_14] : memref<1x14x14x128xf32, #tpu.memory_space<vmem>>, vector<1x14x14x128xf32>
    tpu.vector_store %arg4[%c0_11, %c0_12, %c0_13, %c0_14], %31 {strides = array<i32>} : memref<1x14x14x128xf32, #tpu.memory_space<vmem>>, vector<1x14x14x128xf32>,
    return
  }
  func.func @transform_0(%arg0: i32) -> (i32, i32, i32, i32) {
    %c0_i32 = arith.constant 0 : i32
    %c0_i32_0 = arith.constant 0 : i32
    %c0_i32_1 = arith.constant 0 : i32
    %c0_i32_2 = arith.constant 0 : i32
    return %arg0, %c0_i32, %c0_i32_0, %c0_i32_1 : i32, i32, i32, i32
  }
  func.func @transform_1(%arg0: i32) -> (i32, i32) {
    %c0_i32 = arith.constant 0 : i32
    %c0_i32_0 = arith.constant 0 : i32
    %c0_i32_1 = arith.constant 0 : i32
    return %c0_i32, %c0_i32_0 : i32, i32
  }
  func.func @transform_2(%arg0: i32) -> (i32, i32) {
    %c0_i32 = arith.constant 0 : i32
    %c0_i32_0 = arith.constant 0 : i32
    %c0_i32_1 = arith.constant 0 : i32
    return %c0_i32, %c0_i32_0 : i32, i32
  }
  func.func @transform_3(%arg0: i32) -> (i32, i32, i32, i32) {
    %c0_i32 = arith.constant 0 : i32
    %c0_i32_0 = arith.constant 0 : i32
    %c0_i32_1 = arith.constant 0 : i32
    %c0_i32_2 = arith.constant 0 : i32
    return %arg0, %c0_i32, %c0_i32_0, %c0_i32_1 : i32, i32, i32, i32
  }
}

</mosaic_0001>

<bundles_post_ra>
// kernel: conv_bn_act.1
= control target key start
LH: loop header
LB: loop body
LE: loop exit
PB: predicated region body
PF: predicated region fallthrough
CT: control target
= control target key end

     0   :  { %s2042_s12 = smov 0   ;;  %s2802_s0 = inlined_call_operand.vmem [shape: f32[2,16,16,4], index: 0, kind: input, shape index: {}]   ;;  %s2803_s1 = inlined_call_operand.vmem [shape: bf16[36,128], index: 1, kind: input, shape index: {}]   ;;  %s2804_s2 = inlined_call_operand.vmem [shape: f32[1,128], index: 2, kind: input, shape index: {}]   ;;  %s2805_s3 = inlined_call_operand.vmem [shape: f32[2,14,14,128], index: 3, kind: output, shape index: {}]  }
   0x1 LB: > { %s1894_s13 = sadd.s32 4294967295, %s2012_s12   ;;  %p1898_p0 = scmp.ge.s32.totalorder %s2012_s12, 1  ;;  %s2012_s12 = sphi %s2042_s12, %s13_s12  }
   0x2   : > { %p137_p1 = scmp.lt.s32.totalorder %s2012_s12, 3 }
   0x4   : > { %p138_p2 = pnand %p1898_p0, %p137_p1 }
   0x5   : > { %p161_p3 = scmp.lt.s32.totalorder (!%p138_p2), %s1894_s13, 1  ;;  %s2014_s18 = smov (!%p138_p2), 12  }
   0x6   : > { %141 = sbr.rel (%p138_p2) target bundleno = 631 (0x277), region = 32  ;;  %s2015_s19 = smov (!%p138_p2), 8  }
   0x7   : > { %s2016_s20 = smov (!%p138_p2), 20   ;;  %s2017_s21 = smov (!%p138_p2), 16  }
   0x8   : > { %s2018_s22 = smov (!%p138_p2), 4   ;;  %s2019_s23 = smov (!%p138_p2), 28  }
   0x9   : > { %s2020_s24 = smov (!%p138_p2), 24   ;;  %s2021_s25 = smov (!%p138_p2), 32  }
   0xb   : > { %s2807_s13 = smov (!%p161_p3, %s1894_s13), 1  ;;  %vm1251_vm0 = vcmask 1041408   ;;  %vm668_vm1 = vcmask 31744   ;;  %vm697_vm2 = vcmask 64512   ;;  %vm726_vm3 = vcmask 97280  }
   0xc   : > { %s1925_s14 = sshll.u32 %s2807_s13, 8  ;;  %vm755_vm4 = vcmask 130048   ;;  %vm784_vm5 = vcmask 162816   ;;  %vm813_vm6 = vcmask 195584   ;;  %vm842_vm7 = vcmask 228352   ;;  %s1937_s7 = smul.u32 224, %s2807_s13 }
   0xd   : > { %s2056_s17 = scalar_lea.vmem %s2802_s0, %s1925_s14  ;;  %vm871_vm8 = vcmask 261120   ;;  %vm1224_vm9 = vcmask 293888  }
   0xe   : > { %v174_v0 = vld [vmem:[%s2056_s17 + $0x10] sm:$0xff]  ;;  %v175_v1 = vld [vmem:[%s2056_s17 + $0x18] sm:$0xff]  ;;  %v172_v2 = vld [vmem:[%s2056_s17] sm:$0xff]  ;;  %s2648_s10 = scalar_lea.vmem %s2805_s3, %s1937_s7 }
   0xf   : > { %v206_v3 = vpack.c.bf16 %v174_v0, %v174_v0  ;;  %v207_v4 = vpack.c.bf16 %v175_v1, %v175_v1  ;;  %v173_v5 = vld [vmem:[%s2056_s17 + $0x8] sm:$0xff]  ;;  %v204_v6 = vpack.c.bf16 %v172_v2, %v172_v2  ;;  %v176_v7 = vld [vmem:[%s2056_s17 + $0x20] sm:$0xff]  ;;  %v178_v35 = vld [vmem:[%s2056_s17 + $0x30] sm:$0xff] }
  0x10   : > { %v177_v8 = vld [vmem:[%s2056_s17 + $0x28] sm:$0xff]  ;;  %v205_v9 = vpack.c.bf16 %v173_v5, %v173_v5  ;;  %v208_v10 = vpack.c.bf16 %v176_v7, %v176_v7  ;;  %v179_v36 = vld [vmem:[%s2056_s17 + $0x38] sm:$0xff]  ;;  %v210_v38 = vpack.c.bf16 %v178_v35, %v178_v35  ;;  %v180_v43 = vld [vmem:[%s2056_s17 + $0x40] sm:$0xff] }
  0x11   : > { %v266_v11 = vunpack.c.l.b16 %v206_v3  ;;  %v267_v12 = vunpack.c.l.b16 %v207_v4  ;;  %v264_v13 = vunpack.c.l.b16 %v204_v6  ;;  %v209_v14 = vpack.c.bf16 %v177_v8, %v177_v8  ;;  %v181_v44 = vld [vmem:[%s2056_s17 + $0x48] sm:$0xff]  ;;  %v182_v60 = vld [vmem:[%s2056_s17 + $0x50] sm:$0xff]  ;;  %v183_v61 = vld [vmem:[%s2056_s17 + $0x58] sm:$0xff] }
  0x12   : > { %v265_v15 = vunpack.c.l.b16 %v205_v9  ;;  %v268_v19 = vunpack.c.l.b16 %v208_v10  ;;  %v211_v39 = vpack.c.bf16 %v179_v36, %v179_v36  ;;  %v270_v40 = vunpack.c.l.b16 %v210_v38  ;;  %v184_v6 = vld [vmem:[%s2056_s17 + $0x60] sm:$0xff]  ;;  %v185_v7 = vld [vmem:[%s2056_s17 + $0x68] sm:$0xff] }
  0x13   : > { %v2064_v16 = vpack.c.b16 %v267_v12, %v266_v11  ;;  %v269_v20 = vunpack.c.l.b16 %v209_v14  ;;  %v212_v46 = vpack.c.bf16 %v180_v43, %v180_v43  ;;  %v213_v47 = vpack.c.bf16 %v181_v44, %v181_v44  ;;  %v189_v43 = vld [vmem:[%s2056_s17 + $0x88] sm:$0xff] }
  0x14   : > { %v2066_v17 = vpack.c.b16 %v265_v15, %v264_v13  ;;  %v271_v41 = vunpack.c.l.b16 %v211_v39  ;;  %v214_v62 = vpack.c.bf16 %v182_v60, %v182_v60  ;;  %v215_v63 = vpack.c.bf16 %v183_v61, %v183_v61 }
  0x15   : > { %479 = vrot.lane.b32.xlu1 %v2064_v16, %s2014_s18  ;;  %v433_v18 = vrot.slane %v2064_v16, 1  ;;  %v316_v21 = vshll.u32 %v2064_v16, 16  ;;  %v2075_v23 = vpack.c.b16 %v269_v20, %v268_v19  ;;  %v314_v24 = vshrl.u32 %v2064_v16, 16 }
  0x16   : > { %v432_v22 = vrot.slane %v2066_v17, 1  ;;  %v309_v27 = vshll.u32 %v2066_v17, 16  ;;  %v307_v31 = vshrl.u32 %v2066_v17, 16  ;;  %v2096_v42 = vpack.c.b16 %v271_v41, %v270_v40  ;;  %v188_v41 = vld [vmem:[%s2056_s17 + $0x80] sm:$0xff] }
  0x17   : > { %448 = vrot.lane.b32.xlu2 %v433_v18, %s2015_s19  ;;  %v318_v25 = vrot.slane %v316_v21, 1  ;;  %v323_v26 = vshll.u32 %v2075_v23, 16  ;;  %v321_v29 = vshrl.u32 %v2075_v23, 16  ;;  %v434_v37 = vrot.slane %v2075_v23, 1  ;;  %v186_v21 = vld [vmem:[%s2056_s17 + $0x70] sm:$0xff] }
  0x18   : > { %446 = vrot.lane.b32.xlu0 %v432_v22, %s2015_s19  ;;  %v311_v32 = vrot.slane %v309_v27, 1  ;;  %v330_v45 = vshll.u32 %v2096_v42, 16  ;;  %v328_v48 = vshrl.u32 %v2096_v42, 16  ;;  %v272_v50 = vunpack.c.l.b16 %v212_v46  ;;  %v187_v22 = vld [vmem:[%s2056_s17 + $0x78] sm:$0xff] }
  0x19   : > { %v319_v28 = vor.u32 %v318_v25, %v314_v24  ;;  %v325_v30 = vrot.slane %v323_v26, 1  ;;  %v273_v51 = vunpack.c.l.b16 %v213_v47  ;;  %v435_v54 = vrot.slane %v2096_v42, 1  ;;  %v1002_v47 = vld [vmem:[%s2803_s1 + $0x10] sm:$0x3] }
  0x1a   : > { %v312_v34 = vor.u32 %v311_v32, %v307_v31  ;;  %v332_v49 = vrot.slane %v330_v45, 1  ;;  %v274_v0 = vunpack.c.l.b16 %v214_v62  ;;  %v275_v1 = vunpack.c.l.b16 %v215_v63 }
  0x1b   : > { %v326_v33 = vor.u32 %v325_v30, %v321_v29  ;;  %v2107_v53 = vpack.c.b16 %v273_v51, %v272_v50  ;;  %v216_v9 = vpack.c.bf16 %v184_v6, %v184_v6  ;;  %v217_v10 = vpack.c.bf16 %v185_v7, %v185_v7  ;;  %v190_v6 = vld [vmem:[%s2056_s17 + $0x90] sm:$0xff]  ;;  %v191_v7 = vld [vmem:[%s2056_s17 + $0x98] sm:$0xff] }
  0x1c   : > { %v333_v52 = vor.u32 %v332_v49, %v328_v48  ;;  %v2129_v2 = vpack.c.b16 %v275_v1, %v274_v0  ;;  %v218_v25 = vpack.c.bf16 %v186_v21, %v186_v21  ;;  %v219_v26 = vpack.c.bf16 %v187_v22, %v187_v22 }
  0x1d   : > { %543 = vrot.lane.b32.xlu1 %v433_v18, %s2016_s20  ;;  %v337_v55 = vshll.u32 %v2107_v53, 16  ;;  %v335_v56 = vshrl.u32 %v2107_v53, 16  ;;  %v436_v59 = vrot.slane %v2107_v53, 1  ;;  %v276_v12 = vunpack.c.l.b16 %v216_v9 }
  0x1e   : > { %v344_v3 = vshll.u32 %v2129_v2, 16  ;;  %v342_v4 = vshrl.u32 %v2129_v2, 16  ;;  %v437_v8 = vrot.slane %v2129_v2, 1  ;;  %v277_v13 = vunpack.c.l.b16 %v217_v10 }
  0x1f   : > { %514 = vrot.lane.b32.xlu2 %v319_v28, %s2017_s21  ;;  %v339_v57 = vrot.slane %v337_v55, 1  ;;  %v278_v27 = vunpack.c.l.b16 %v218_v25  ;;  %v220_v45 = vpack.c.bf16 %v188_v41, %v188_v41  ;;  %v221_v46 = vpack.c.bf16 %v189_v43, %v189_v43 }
  0x20   : > { %481 = vrot.lane.b32.xlu0 %v2075_v23, %s2014_s18  ;;  %v346_v5 = vrot.slane %v344_v3, 1  ;;  %v2143_v14 = vpack.c.b16 %v277_v13, %v276_v12  ;;  %v1218_v49 = vunpack.c.l.b16 %v1002_v47  ;;  %v222_v12 = vpack.c.bf16 %v190_v6, %v190_v6 }
  0x21   : > { %v340_v58 = vor.u32 %v339_v57, %v335_v56  ;;  %v223_v13 = vpack.c.bf16 %v191_v7, %v191_v7 }
  0x22   : > { %v347_v11 = vor.u32 %v346_v5, %v342_v4  ;;  %v351_v15 = vshll.u32 %v2143_v14, 16  ;;  %v349_v18 = vshrl.u32 %v2143_v14, 16  ;;  %v438_v30 = vrot.slane %v2143_v14, 1 }
  0x23   : > { %v1221_v51 = vpack.c.b16 %v1218_v49, %v1218_v49  ;;  %v283_v25 = vunpack.c.l.b16 %v223_v13 }
  0x24   : > { %v353_v19 = vrot.slane %v351_v15, 1 }
  0x25   : > { %406 = vrot.lane.b32.xlu1 %v319_v28, %s2018_s22  ;;  %v279_v28 = vunpack.c.l.b16 %v219_v26  ;;  %v1253_v55 = vsel %vm1251_vm0, %v1221_v51, 0 }
  0x26   : > { %v354_v24 = vor.u32 %v353_v19, %v349_v18  ;;  %1260 = vmatpush.bf16.msra.mxu0 %v1253_v55  ;;  %1928 = vmatpush.bf16.msra.mxu1 %v1253_v55 }
  0x27   : > { %516 = vrot.lane.b32.xlu2 %v326_v33, %s2017_s21  ;;  %v2163_v31 = vpack.c.b16 %v279_v28, %v278_v27  ;;  %1929 = vmatpush.bf16.msra.mxu2 %v1253_v55 }
  0x28   : > { %404 = vrot.lane.b32.xlu0 %v312_v34, %s2018_s22  ;;  %1930 = vmatpush.bf16.msra.mxu3 %v1253_v55 }
  0x29   : > { %v358_v32 = vshll.u32 %v2163_v31, 16  ;;  %v356_v34 = vshrl.u32 %v2163_v31, 16  ;;  %v2182_v40 = vrot.slane %v2163_v31, 1 }
  0x2b   : > { %v360_v35 = vrot.slane %v358_v32, 1 }
  0x2d   : > { %545 = vrot.lane.b32.xlu1 %v434_v37, %s2016_s20 }
  0x2f   : > { %611 = vrot.lane.b32.xlu2 %v326_v33, %s2019_s23 }
  0x30   : > { %576 = vrot.lane.b32.xlu0 %v2075_v23, %s2020_s24 }
  0x35   : > { %640 = vrot.lane.b32.xlu1 %v434_v37, %s2021_s25 }
  0x37   : > { %408 = vrot.lane.b32.xlu2 %v326_v33, %s2018_s22 }
  0x38   : > { %578 = vrot.lane.b32.xlu0 %v2096_v42, %s2020_s24 }
  0x3d   : > { %450 = vrot.lane.b32.xlu1 %v434_v37, %s2015_s19  ;;  %v2175_v37 = vor.u32 %v360_v35, %v356_v34 }
  0x3f   : > { %642 = vrot.lane.b32.xlu2 %v435_v54, %s2021_s25 }
  0x40   : > { %613 = vrot.lane.b32.xlu0 %v333_v52, %s2019_s23 }
  0x45   : > { %518 = vrot.lane.b32.xlu1 %v333_v52, %s2017_s21 }
  0x47   : > { %547 = vrot.lane.b32.xlu2 %v435_v54, %s2016_s20 }
  0x48   : > { %483 = vrot.lane.b32.xlu0 %v2096_v42, %s2014_s18 }
  0x4d   : > { %615 = vrot.lane.b32.xlu1 %v340_v58, %s2019_s23 }
  0x4f   : > { %644 = vrot.lane.b32.xlu2 %v436_v59, %s2021_s25 }
  0x50   : > { %580 = vrot.lane.b32.xlu0 %v2107_v53, %s2020_s24 }
  0x55   : > { %452 = vrot.lane.b32.xlu1 %v435_v54, %s2015_s19  ;;  %v281_v54 = vunpack.c.l.b16 %v221_v46 }
  0x57   : > { %485 = vrot.lane.b32.xlu2 %v2107_v53, %s2014_s18 }
  0x58   : > { %410 = vrot.lane.b32.xlu0 %v333_v52, %s2018_s22  ;;  %v280_v52 = vunpack.c.l.b16 %v220_v45 }
  0x5a   : > { %v2201_v57 = vpack.c.b16 %v281_v54, %v280_v52 }
  0x5c   : > { %v365_v63 = vshll.u32 %v2201_v57, 16  ;;  %v363_v4 = vshrl.u32 %v2201_v57, 16 }
  0x5d   : > { %549 = vrot.lane.b32.xlu1 %v436_v59, %s2016_s20 }
  0x5e   : > { %v367_v5 = vrot.slane %v365_v63, 1 }
  0x5f   : > { %582 = vrot.lane.b32.xlu2 %v2129_v2, %s2020_s24 }
  0x60   : > { %520 = vrot.lane.b32.xlu0 %v340_v58, %s2017_s21  ;;  %v368_v18 = vor.u32 %v367_v5, %v363_v4 }
  0x65   : > { %646 = vrot.lane.b32.xlu1 %v437_v8, %s2021_s25 }
  0x67   : > { %412 = vrot.lane.b32.xlu2 %v340_v58, %s2018_s22 }
  0x68   : > { %617 = vrot.lane.b32.xlu0 %v347_v11, %s2019_s23 }
  0x6d   : > { %487 = vrot.lane.b32.xlu1 %v2129_v2, %s2014_s18 }
  0x6f   : > { %522 = vrot.lane.b32.xlu2 %v347_v11, %s2017_s21 }
  0x70   : > { %454 = vrot.lane.b32.xlu0 %v436_v59, %s2015_s19  ;;  %v1927_v59 = vld [vmem:[%s2803_s1 + $0x8] sm:$0xff] }
  0x71   : > { %v2151_v20 = vpop.permute.xlu2 %448  ;;  %1261 = vmatpush.bf16.msra.mxu0 %v1927_v59  ;;  %1931 = vmatpush.bf16.msra.mxu1 %v1927_v59 }
  0x72   : > { %1932 = vmatpush.bf16.msra.mxu2 %v1927_v59  ;;  %1933 = vmatpush.bf16.msra.mxu3 %v1927_v59 }
  0x75   : > { %584 = vrot.lane.b32.xlu1 %v2143_v14, %s2020_s24 }
  0x77   : > { %619 = vrot.lane.b32.xlu2 %v354_v24, %s2019_s23 }
  0x78   : > { %551 = vrot.lane.b32.xlu0 %v437_v8, %s2016_s20 }
  0x79   : > { %v2159_v29 = vpop.permute.xlu2 %514 }
  0x7d   : > { %414 = vrot.lane.b32.xlu1 %v347_v11, %s2018_s22 }
  0x7f   : > { %456 = vrot.lane.b32.xlu2 %v437_v8, %s2015_s19  ;;  %v2228_v8 = vrot.slane %v2201_v57, 1 }
  0x80   : > { %648 = vrot.lane.b32.xlu0 %v438_v30, %s2021_s25 }
  0x81   : > { %v2168_v33 = vpop.permute.xlu2 %516 }
  0x85   : > { %524 = vrot.lane.b32.xlu1 %v354_v24, %s2017_s21 }
  0x87   : > { %v480_v36 = vpop.permute.xlu1 %479  ;;  %553 = vrot.lane.b32.xlu2 %v438_v30, %s2016_s20 }
  0x88   : > { %489 = vrot.lane.b32.xlu0 %v2143_v14, %s2014_s18 }
  0x89   : > { %v2177_v38 = vpop.permute.xlu2 %611 }
  0x8a   : > { %v447_v39 = vpop.permute.xlu0 %446 }
  0x8d   : > { %621 = vrot.lane.b32.xlu1 %v2175_v37, %s2019_s23 }
  0x8f   : > { %v544_v44 = vpop.permute.xlu1 %543  ;;  %650 = vrot.lane.b32.xlu2 %v2182_v40, %s2021_s25 }
  0x90   : > { %586 = vrot.lane.b32.xlu0 %v2163_v31, %s2020_s24 }
  0x91   : > { %v2193_v48 = vpop.permute.xlu2 %408 }
  0x92   : > { %v2195_v50 = vpop.permute.xlu0 %481  ;;  %v674_v52 = vsel %vm668_vm1, %v2075_v23, %v2193_v48  ;;  %v192_v48 = vld [vmem:[%s2056_s17 + $0xa0] sm:$0xff] }
  0x93   : > { %v224_v5 = vpack.c.bf16 %v192_v48, %v192_v48 }
  0x95   : > { %458 = vrot.lane.b32.xlu1 %v438_v30, %s2015_s19 }
  0x97   : > { %v407_v56 = vpop.permute.xlu1 %406  ;;  %491 = vrot.lane.b32.xlu2 %v2163_v31, %s2014_s18 }
  0x98   : > { %416 = vrot.lane.b32.xlu0 %v354_v24, %s2018_s22  ;;  %v672_v19 = vsel %vm668_vm1, %v2064_v16, %v407_v56  ;;  %v282_v24 = vunpack.c.l.b16 %v222_v12 }
  0x99   : > { %v2203_v58 = vpop.permute.xlu2 %642  ;;  %v701_v16 = vsel %vm697_vm2, %v672_v19, %v2151_v20 }
  0x9a   : > { %v405_v60 = vpop.permute.xlu0 %404 }
  0x9b   : > { %v670_v61 = vsel %vm668_vm1, %v2066_v17, %v405_v60  ;;  %v1926_v17 = vld [vmem:[%s2803_s1] sm:$0xff] }
  0x9c   : > { %v699_v62 = vsel %vm697_vm2, %v670_v61, %v447_v39  ;;  %1262 = vmatpush.bf16.msra.mxu0 %v1926_v17  ;;  %1934 = vmatpush.bf16.msra.mxu1 %v1926_v17 }
  0x9d   : > { %v728_v0 = vsel %vm726_vm3, %v699_v62, %v480_v36  ;;  %555 = vrot.lane.b32.xlu1 %v2182_v40, %s2016_s20  ;;  %1935 = vmatpush.bf16.msra.mxu2 %v1926_v17  ;;  %v2248_v36 = vpack.c.b16 %v283_v25, %v282_v24 }
  0x9e   : > { %v757_v3 = vsel %vm755_vm4, %v728_v0, %v2159_v29  ;;  %1936 = vmatpush.bf16.msra.mxu3 %v1926_v17  ;;  %v193_v0 = vld [vmem:[%s2056_s17 + $0xa8] sm:$0xff] }
  0x9f   : > { %v546_v1 = vpop.permute.xlu1 %545  ;;  %588 = vrot.lane.b32.xlu2 %v2201_v57, %s2020_s24  ;;  %v786_v11 = vsel %vm784_vm5, %v757_v3, %v544_v44  ;;  %v372_v39 = vshll.u32 %v2248_v36, 16  ;;  %v370_v44 = vshrl.u32 %v2248_v36, 16  ;;  %v441_v62 = vrot.slane %v2248_v36, 1 }
  0xa0   : > { %526 = vrot.lane.b32.xlu0 %v2175_v37, %s2017_s21  ;;  %v225_v6 = vpack.c.bf16 %v193_v0, %v193_v0  ;;  %v196_v0 = vld [vmem:[%s2056_s17 + $0xc0] sm:$0xff] }
  0xa1   : > { %v2230_v9 = vpop.permute.xlu2 %547  ;;  %v374_v45 = vrot.slane %v372_v39, 1 }
  0xa2   : > { %v577_v10 = vpop.permute.xlu0 %576 }
  0xa3   : > { %v815_v15 = vsel %vm813_vm6, %v786_v11, %v577_v10 }
  0xa4   : > { %v844_v21 = vsel %vm842_vm7, %v815_v15, %v2177_v38  ;;  %v730_v38 = vsel %vm726_vm3, %v701_v16, %v2195_v50  ;;  %v284_v15 = vunpack.c.l.b16 %v224_v5 }
  0xa5   : > { %652 = vrot.lane.b32.xlu1 %v2228_v8, %s2021_s25  ;;  %v759_v41 = vsel %vm755_vm4, %v730_v38, %v2168_v33  ;;  %v2270_v33 = vor.u32 %v374_v45, %v370_v44 }
  0xa6   : > { %v788_v43 = vsel %vm784_vm5, %v759_v41, %v546_v1 }
  0xa7   : > { %v641_v22 = vpop.permute.xlu1 %640  ;;  %418 = vrot.lane.b32.xlu2 %v2175_v37, %s2018_s22 }
  0xa8   : > { %v873_v26 = vsel %vm871_vm8, %v844_v21, %v641_v22  ;;  %623 = vrot.lane.b32.xlu0 %v368_v18, %s2019_s23 }
  0xa9   : > { %v914_v27 = vrot.slane %v873_v26, 1  ;;  %v915_v28 = vrot.slane %v873_v26, 2  ;;  %v916_v29 = vrot.slane %v873_v26, 3  ;;  %1007 = vst [vmem:[#allocation1] ss:$9 sm:$0xff] %v873_v26  ;;  %v2244_v30 = vpop.permute.xlu2 %644  ;;  %v917_v32 = vrot.slane %v873_v26, 4 }
  0xaa   : > { %v579_v34 = vpop.permute.xlu0 %578  ;;  %v918_v35 = vrot.slane %v873_v26, 5  ;;  %v919_v37 = vrot.slane %v873_v26, 6 }
  0xab   : > { %1010 = vst [vmem:[#allocation1 + $0x1] ss:$9 sm:$0xff] %v914_v27  ;;  %v817_v47 = vsel %vm813_vm6, %v788_v43, %v579_v34 }
  0xac   : > { %1013 = vst [vmem:[#allocation1 + $0x2] ss:$9 sm:$0xff] %v915_v28  ;;  %v194_v28 = vld [vmem:[%s2056_s17 + $0xb0] sm:$0xff] }
  0xad   : > { %1016 = vst [vmem:[#allocation1 + $0x3] ss:$9 sm:$0xff] %v916_v29  ;;  %493 = vrot.lane.b32.xlu1 %v2201_v57, %s2014_s18  ;;  %v195_v29 = vld [vmem:[%s2056_s17 + $0xb8] sm:$0xff]  ;;  %v226_v39 = vpack.c.bf16 %v194_v28, %v194_v28 }
  0xae   : > { %1019 = vst [vmem:[#allocation1 + $0x4] ss:$9 sm:$0xff] %v917_v32 }
  0xaf   : > { %1022 = vst [vmem:[#allocation1 + $0x5] ss:$9 sm:$0xff] %v918_v35  ;;  %v451_v20 = vpop.permute.xlu1 %450  ;;  %528 = vrot.lane.b32.xlu2 %v368_v18, %s2017_s21 }
  0xb0   : > { %1025 = vst [vmem:[#allocation1 + $0x6] ss:$9 sm:$0xff] %v919_v37  ;;  %460 = vrot.lane.b32.xlu0 %v2182_v40, %s2015_s19  ;;  %v703_v56 = vsel %vm697_vm2, %v674_v52, %v451_v20  ;;  %v227_v20 = vpack.c.bf16 %v195_v29, %v195_v29 }
  0xb1   : > { %v2262_v46 = vpop.permute.xlu2 %485 }
  0xb2   : > { %v614_v49 = vpop.permute.xlu0 %613 }
  0xb3   : > { %v846_v50 = vsel %vm842_vm7, %v817_v47, %v614_v49 }
  0xb4   : > { %v875_v51 = vsel %vm871_vm8, %v846_v50, %v2203_v58 }
  0xb5   : > { %1027 = vst [vmem:[#allocation1 + $0x7] ss:$9 sm:$0xff] %v875_v51  ;;  %590 = vrot.lane.b32.xlu1 %v2248_v36, %s2020_s24  ;;  %v920_v58 = vrot.slane %v875_v51, 1  ;;  %v921_v59 = vrot.slane %v875_v51, 2  ;;  %v922_v63 = vrot.slane %v875_v51, 3  ;;  %v923_v23 = vrot.slane %v875_v51, 4 }
  0xb6   : > { %v924_v17 = vrot.slane %v875_v51, 5  ;;  %v925_v4 = vrot.slane %v875_v51, 6  ;;  %v286_v51 = vunpack.c.l.b16 %v226_v39  ;;  %v199_v39 = vld [vmem:[%s2056_s17 + $0xd8] sm:$0xff] }
  0xb7   : > { %v519_v40 = vpop.permute.xlu1 %518  ;;  %625 = vrot.lane.b32.xlu2 %v2270_v33, %s2019_s23 }
  0xb8   : > { %557 = vrot.lane.b32.xlu0 %v2228_v8, %s2016_s20 }
  0xb9   : > { %v2279_v54 = vpop.permute.xlu2 %582 }
  0xba   : > { %v484_v55 = vpop.permute.xlu0 %483 }
  0xbb   : > { %v732_v61 = vsel %vm726_vm3, %v703_v56, %v484_v55 }
  0xbc   : > { %v1028_v60 = vld [vmem:[#allocation1] sm:$0xff]  ;;  %v761_v1 = vsel %vm755_vm4, %v732_v61, %v519_v40 }
  0xbd   : > { %1030 = vst [vmem:[#allocation1] ss:$9 sm:$0xff] %v920_v58  ;;  %1910 = vmatmul.msk.bf16.vlgmr.msra.gmra.mxu0 %vm1224_vm9, %v1028_v60  ;;  %420 = vrot.lane.b32.xlu1 %v368_v18, %s2018_s22  ;;  %v790_v10 = vsel %vm784_vm5, %v761_v1, %v2230_v9  ;;  %v285_v18 = vunpack.c.l.b16 %v225_v6  ;;  %v228_v6 = vpack.c.bf16 %v196_v0, %v196_v0 }
  0xbe   : > { %1032 = vst [vmem:[#allocation1 + $0x1] ss:$9 sm:$0xff] %v921_v59 }
  0xbf   : > { %1034 = vst [vmem:[#allocation1 + $0x2] ss:$9 sm:$0xff] %v922_v63  ;;  %v616_v3 = vpop.permute.xlu1 %615  ;;  %462 = vrot.lane.b32.xlu2 %v2228_v8, %s2015_s19  ;;  %v2305_v9 = vpack.c.b16 %v285_v18, %v284_v15 }
  0xc0   : > { %1036 = vst [vmem:[#allocation1 + $0x3] ss:$9 sm:$0xff] %v923_v23  ;;  %654 = vrot.lane.b32.xlu0 %v441_v62, %s2021_s25 }
  0xc1   : > { %1038 = vst [vmem:[#allocation1 + $0x4] ss:$9 sm:$0xff] %v924_v17  ;;  %v2292_v7 = vpop.permute.xlu2 %412  ;;  %v379_v25 = vshll.u32 %v2305_v9, 16  ;;  %v2327_v47 = vrot.slane %v2305_v9, 1  ;;  %v197_v17 = vld [vmem:[%s2056_s17 + $0xc8] sm:$0xff] }
  0xc2   : > { %1040 = vst [vmem:[#allocation1 + $0x5] ss:$9 sm:$0xff] %v925_v4  ;;  %v581_v11 = vpop.permute.xlu0 %580  ;;  %v678_v4 = vsel %vm668_vm1, %v2107_v53, %v2292_v7 }
  0xc3   : > { %v819_v12 = vsel %vm813_vm6, %v790_v10, %v581_v11  ;;  %v381_v37 = vrot.slane %v379_v25, 1  ;;  %v229_v10 = vpack.c.bf16 %v197_v17, %v197_v17 }
  0xc4   : > { %v848_v13 = vsel %vm842_vm7, %v819_v12, %v616_v3 }
  0xc5   : > { %v877_v8 = vsel %vm871_vm8, %v848_v13, %v2244_v30  ;;  %495 = vrot.lane.b32.xlu1 %v2248_v36, %s2014_s18 }
  0xc6   : > { %v926_v19 = vrot.slane %v877_v8, 1  ;;  %1041 = vst [vmem:[#allocation1 + $0x6] ss:$9 sm:$0xff] %v877_v8  ;;  %v927_v27 = vrot.slane %v877_v8, 2  ;;  %v928_v30 = vrot.slane %v877_v8, 3  ;;  %v929_v34 = vrot.slane %v877_v8, 4 }
  0xc7   : > { %v453_v21 = vpop.permute.xlu1 %452  ;;  %464 = vrot.lane.b32.xlu2 %v441_v62, %s2015_s19  ;;  %v930_v38 = vrot.slane %v877_v8, 5  ;;  %v931_v43 = vrot.slane %v877_v8, 6 }
  0xc8   : > { %1043 = vst [vmem:[#allocation1 + $0x7] ss:$9 sm:$0xff] %v926_v19  ;;  %422 = vrot.lane.b32.xlu0 %v2270_v33, %s2018_s22  ;;  %v288_v19 = vunpack.c.l.b16 %v228_v6 }
  0xc9   : > { %v2307_v22 = vpop.permute.xlu2 %522 }
  0xca   : > { %v411_v24 = vpop.permute.xlu0 %410 }
  0xcb   : > { %v676_v26 = vsel %vm668_vm1, %v2096_v42, %v411_v24  ;;  %v377_v42 = vshrl.u32 %v2305_v9, 16 }
  0xcc   : > { %v705_v35 = vsel %vm697_vm2, %v676_v26, %v453_v21  ;;  %v289_v21 = vunpack.c.l.b16 %v229_v10 }
  0xcd   : > { %497 = vrot.lane.b32.xlu1 %v2305_v9, %s2014_s18  ;;  %v734_v45 = vsel %vm726_vm3, %v705_v35, %v2262_v46  ;;  %v382_v50 = vor.u32 %v381_v37, %v377_v42 }
  0xce   : > { %v2372_v28 = vpack.c.b16 %v289_v21, %v288_v19 }
  0xcf   : > { %v1044_v16 = vld [vmem:[#allocation1] sm:$0xff]  ;;  %v550_v32 = vpop.permute.xlu1 %549  ;;  %559 = vrot.lane.b32.xlu2 %v441_v62, %s2016_s20 }
  0xd0   : > { %1046 = vst [vmem:[#allocation1] ss:$9 sm:$0xff] %v927_v27  ;;  %530 = vrot.lane.b32.xlu0 %v2270_v33, %s2017_s21  ;;  %1911 = vmatmul.msk.bf16.gmra.mxu0 %vm1224_vm9, %v1044_v16  ;;  %v287_v33 = vunpack.c.l.b16 %v227_v20 }
  0xd1   : > { %1048 = vst [vmem:[#allocation1 + $0x1] ss:$9 sm:$0xff] %v928_v30  ;;  %v2322_v41 = vpop.permute.xlu2 %619  ;;  %v393_v30 = vshll.u32 %v2372_v28, 16 }
  0xd2   : > { %1050 = vst [vmem:[#allocation1 + $0x2] ss:$9 sm:$0xff] %v929_v34  ;;  %v521_v44 = vpop.permute.xlu0 %520  ;;  %v2336_v46 = vpack.c.b16 %v287_v33, %v286_v51  ;;  %v391_v34 = vshrl.u32 %v2372_v28, 16 }
  0xd3   : > { %1052 = vst [vmem:[#allocation1 + $0x3] ss:$9 sm:$0xff] %v930_v38  ;;  %v763_v49 = vsel %vm755_vm4, %v734_v45, %v521_v44  ;;  %v198_v38 = vld [vmem:[%s2056_s17 + $0xd0] sm:$0xff] }
  0xd4   : > { %1054 = vst [vmem:[#allocation1 + $0x4] ss:$9 sm:$0xff] %v931_v43  ;;  %v792_v40 = vsel %vm784_vm5, %v763_v49, %v550_v32  ;;  %v386_v61 = vshll.u32 %v2336_v46, 16  ;;  %v2354_v1 = vrot.slane %v2336_v46, 1  ;;  %v230_v49 = vpack.c.bf16 %v198_v38, %v198_v38 }
  0xd5   : > { %592 = vrot.lane.b32.xlu1 %v2305_v9, %s2020_s24  ;;  %v821_v56 = vsel %vm813_vm6, %v792_v40, %v2279_v54  ;;  %v384_v54 = vshrl.u32 %v2336_v46, 16 }
  0xd6   : > { %v388_v48 = vrot.slane %v386_v61, 1  ;;  %v290_v40 = vunpack.c.l.b16 %v230_v49 }
  0xd7   : > { %v647_v52 = vpop.permute.xlu1 %646  ;;  %561 = vrot.lane.b32.xlu2 %v2327_v47, %s2016_s20 }
  0xd8   : > { %532 = vrot.lane.b32.xlu0 %v382_v50, %s2017_s21  ;;  %v389_v11 = vor.u32 %v388_v48, %v384_v54 }
  0xd9   : > { %v2338_v55 = vpop.permute.xlu2 %456 }
  0xda   : > { %v618_v58 = vpop.permute.xlu0 %617 }
  0xdb   : > { %v850_v59 = vsel %vm842_vm7, %v821_v56, %v618_v58 }
  0xdc   : > { %v879_v60 = vsel %vm871_vm8, %v850_v59, %v647_v52  ;;  %v444_v59 = vrot.slane %v2372_v28, 1 }
  0xdd   : > { %v932_v62 = vrot.slane %v879_v60, 1  ;;  %v933_v63 = vrot.slane %v879_v60, 2  ;;  %1055 = vst [vmem:[#allocation1 + $0x5] ss:$9 sm:$0xff] %v879_v60  ;;  %594 = vrot.lane.b32.xlu1 %v2336_v46, %s2020_s24  ;;  %v934_v13 = vrot.slane %v879_v60, 3  ;;  %v935_v8 = vrot.slane %v879_v60, 4 }
  0xde   : > { %v936_v24 = vrot.slane %v879_v60, 5  ;;  %v937_v7 = vrot.slane %v879_v60, 6 }
  0xdf   : > { %1057 = vst [vmem:[#allocation1 + $0x6] ss:$9 sm:$0xff] %v932_v62  ;;  %v488_v23 = vpop.permute.xlu1 %487  ;;  %656 = vrot.lane.b32.xlu2 %v2327_v47, %s2021_s25 }
  0xe0   : > { %1059 = vst [vmem:[#allocation1 + $0x7] ss:$9 sm:$0xff] %v933_v63  ;;  %627 = vrot.lane.b32.xlu0 %v382_v50, %s2019_s23 }
  0xe1   : > { %v2356_v3 = vpop.permute.xlu2 %553 }
  0xe2   : > { %v455_v5 = vpop.permute.xlu0 %454 }
  0xe3   : > { %v707_v12 = vsel %vm697_vm2, %v678_v4, %v455_v5 }
  0xe4   : > { %v736_v53 = vsel %vm726_vm3, %v707_v12, %v488_v23 }
  0xe5   : > { %658 = vrot.lane.b32.xlu1 %v2354_v1, %s2021_s25  ;;  %v765_v27 = vsel %vm755_vm4, %v736_v53, %v2307_v22  ;;  %v395_v22 = vrot.slane %v393_v30, 1 }
  0xe7   : > { %v1060_v15 = vld [vmem:[#allocation1] sm:$0xff]  ;;  %v585_v18 = vpop.permute.xlu1 %584  ;;  %424 = vrot.lane.b32.xlu2 %v382_v50, %s2018_s22  ;;  %v231_v50 = vpack.c.bf16 %v199_v39, %v199_v39 }
  0xe8   : > { %1062 = vst [vmem:[#allocation1] ss:$9 sm:$0xff] %v934_v13  ;;  %1912 = vmatmul.msk.bf16.gmra.mxu0 %vm1224_vm9, %v1060_v15  ;;  %629 = vrot.lane.b32.xlu0 %v389_v11, %s2019_s23 }
  0xe9   : > { %1064 = vst [vmem:[#allocation1 + $0x1] ss:$9 sm:$0xff] %v935_v8  ;;  %v2368_v25 = vpop.permute.xlu2 %650  ;;  %v291_v52 = vunpack.c.l.b16 %v231_v50 }
  0xea   : > { %1066 = vst [vmem:[#allocation1 + $0x2] ss:$9 sm:$0xff] %v936_v24  ;;  %v552_v26 = vpop.permute.xlu0 %551 }
  0xeb   : > { %1068 = vst [vmem:[#allocation1 + $0x3] ss:$9 sm:$0xff] %v937_v7  ;;  %v794_v29 = vsel %vm784_vm5, %v765_v27, %v552_v26  ;;  %v2407_v60 = vpack.c.b16 %v291_v52, %v290_v40  ;;  %v200_v7 = vld [vmem:[%s2056_s17 + $0xe0] sm:$0xff] }
  0xec   : > { %v823_v16 = vsel %vm813_vm6, %v794_v29, %v585_v18  ;;  %v232_v29 = vpack.c.bf16 %v200_v7, %v200_v7 }
  0xed   : > { %499 = vrot.lane.b32.xlu1 %v2336_v46, %s2014_s18  ;;  %v852_v42 = vsel %vm842_vm7, %v823_v16, %v2322_v41  ;;  %v400_v48 = vshll.u32 %v2407_v60, 16  ;;  %v398_v10 = vshrl.u32 %v2407_v60, 16  ;;  %v2438_v53 = vrot.slane %v2407_v60, 1 }
  0xee   : > { %v476_v38 = vunpack.c.l.b16 %v232_v29 }
  0xef   : > { %v415_v32 = vpop.permute.xlu1 %414  ;;  %534 = vrot.lane.b32.xlu2 %v389_v11, %s2017_s21 }
  0xf0   : > { %466 = vrot.lane.b32.xlu0 %v2327_v47, %s2015_s19  ;;  %v2392_v47 = vor.u32 %v395_v22, %v391_v34  ;;  %v680_v51 = vsel %vm668_vm1, %v2129_v2, %v415_v32 }
  0xf1   : > { %v2383_v35 = vpop.permute.xlu2 %491  ;;  %v709_v33 = vsel %vm697_vm2, %v680_v51, %v2338_v55 }
  0xf2   : > { %v649_v37 = vpop.permute.xlu0 %648 }
  0xf3   : > { %v881_v20 = vsel %vm871_vm8, %v852_v42, %v649_v37 }
  0xf4   : > { %v938_v43 = vrot.slane %v881_v20, 1  ;;  %v939_v44 = vrot.slane %v881_v20, 2  ;;  %v940_v45 = vrot.slane %v881_v20, 3  ;;  %1069 = vst [vmem:[#allocation1 + $0x4] ss:$9 sm:$0xff] %v881_v20  ;;  %v941_v61 = vrot.slane %v881_v20, 4 }
  0xf5   : > { %596 = vrot.lane.b32.xlu1 %v2372_v28, %s2020_s24  ;;  %v942_v62 = vrot.slane %v881_v20, 5  ;;  %v943_v55 = vrot.slane %v881_v20, 6 }
  0xf6   : > { %1071 = vst [vmem:[#allocation1 + $0x5] ss:$9 sm:$0xff] %v938_v43 }
  0xf7   : > { %1073 = vst [vmem:[#allocation1 + $0x6] ss:$9 sm:$0xff] %v939_v44  ;;  %v525_v41 = vpop.permute.xlu1 %524  ;;  %631 = vrot.lane.b32.xlu2 %v2392_v47, %s2019_s23 }
  0xf8   : > { %1075 = vst [vmem:[#allocation1 + $0x7] ss:$9 sm:$0xff] %v940_v45  ;;  %563 = vrot.lane.b32.xlu0 %v2354_v1, %s2016_s20 }
  0xf9   : > { %v2402_v56 = vpop.permute.xlu2 %588 }
  0xfa   : > { %v490_v58 = vpop.permute.xlu0 %489 }
  0xfb   : > { %v738_v2 = vsel %vm726_vm3, %v709_v33, %v490_v58 }
  0xfc   : > { %v767_v23 = vsel %vm755_vm4, %v738_v2, %v525_v41 }
  0xfd   : > { %426 = vrot.lane.b32.xlu1 %v389_v11, %s2018_s22  ;;  %v796_v17 = vsel %vm784_vm5, %v767_v23, %v2356_v3  ;;  %v402_v11 = vrot.slane %v400_v48, 1  ;;  %v203_v48 = vld [vmem:[%s2056_s17 + $0xf8] sm:$0xff] }
  0xff   : > { %v1076_v63 = vld [vmem:[#allocation1] sm:$0xff]  ;;  %v622_v54 = vpop.permute.xlu1 %621  ;;  %468 = vrot.lane.b32.xlu2 %v2354_v1, %s2015_s19  ;;  %v2429_v18 = vor.u32 %v402_v11, %v398_v10 }
 0x100   : > { %1078 = vst [vmem:[#allocation1] ss:$9 sm:$0xff] %v941_v61  ;;  %1913 = vmatmul.msk.bf16.vlgmr.msra.gmra.mxu1 %vm1224_vm9, %v1076_v63  ;;  %660 = vrot.lane.b32.xlu0 %v444_v59, %s2021_s25 }
 0x101   : > { %1080 = vst [vmem:[#allocation1 + $0x1] ss:$9 sm:$0xff] %v942_v62  ;;  %v2415_v0 = vpop.permute.xlu2 %418 }
 0x102   : > { %1082 = vst [vmem:[#allocation1 + $0x2] ss:$9 sm:$0xff] %v943_v55  ;;  %v587_v4 = vpop.permute.xlu0 %586  ;;  %v684_v62 = vsel %vm668_vm1, %v2163_v31, %v2415_v0  ;;  %v202_v55 = vld [vmem:[%s2056_s17 + $0xf0] sm:$0xff] }
 0x103   : > { %v825_v5 = vsel %vm813_vm6, %v796_v17, %v587_v4 }
 0x104   : > { %v854_v1 = vsel %vm842_vm7, %v825_v5, %v622_v54  ;;  %v234_v5 = vpack.c.bf16 %v202_v55, %v202_v55 }
 0x105   : > { %v883_v6 = vsel %vm871_vm8, %v854_v1, %v2368_v25  ;;  %536 = vrot.lane.b32.xlu1 %v2392_v47, %s2017_s21  ;;  %v201_v25 = vld [vmem:[%s2056_s17 + $0xe8] sm:$0xff]  ;;  %v235_v1 = vpack.c.bf16 %v203_v48, %v203_v48 }
 0x106   : > { %v944_v12 = vrot.slane %v883_v6, 1  ;;  %v945_v13 = vrot.slane %v883_v6, 2  ;;  %v946_v8 = vrot.slane %v883_v6, 3  ;;  %1083 = vst [vmem:[#allocation1 + $0x3] ss:$9 sm:$0xff] %v883_v6  ;;  %v947_v3 = vrot.slane %v883_v6, 4 }
 0x107   : > { %v459_v15 = vpop.permute.xlu1 %458  ;;  %565 = vrot.lane.b32.xlu2 %v444_v59, %s2016_s20  ;;  %v233_v30 = vpack.c.bf16 %v201_v25, %v201_v25  ;;  %v949_v32 = vrot.slane %v883_v6, 6 }
 0x108   : > { %1085 = vst [vmem:[#allocation1 + $0x4] ss:$9 sm:$0xff] %v944_v12  ;;  %501 = vrot.lane.b32.xlu0 %v2372_v28, %s2014_s18  ;;  %v573_v12 = vunpack.c.l.b16 %v234_v5 }
 0x109   : > { %1087 = vst [vmem:[#allocation1 + $0x5] ss:$9 sm:$0xff] %v945_v13  ;;  %v2431_v19 = vpop.permute.xlu2 %528  ;;  %v477_v39 = vunpack.c.l.b16 %v233_v30  ;;  %v574_v13 = vunpack.c.l.b16 %v235_v1 }
 0x10a   : > { %1089 = vst [vmem:[#allocation1 + $0x6] ss:$9 sm:$0xff] %v946_v8  ;;  %v417_v21 = vpop.permute.xlu0 %416 }
 0x10b   : > { %1091 = vst [vmem:[#allocation1 + $0x7] ss:$9 sm:$0xff] %v947_v3  ;;  %v682_v24 = vsel %vm668_vm1, %v2143_v14, %v417_v21  ;;  %v948_v14 = vrot.slane %v883_v6, 5  ;;  %v2459_v44 = vpack.c.b16 %v477_v39, %v476_v38  ;;  %v575_v21 = vpack.c.b16 %v574_v13, %v573_v12 }
 0x10c   : > { %v711_v27 = vsel %vm697_vm2, %v682_v24, %v459_v15 }
 0x10d   : > { %633 = vrot.lane.b32.xlu1 %v2429_v18, %s2019_s23  ;;  %v740_v42 = vsel %vm726_vm3, %v711_v27, %v2383_v35  ;;  %v510_v41 = vshll.u32 %v2459_v44, 16  ;;  %v508_v2 = vshrl.u32 %v2459_v44, 16  ;;  %v542_v61 = vrot.slane %v2459_v44, 1 }
 0x10e   : > { %v639_v38 = vrot.slane %v575_v21, 1 }
 0x10f   : > { %v556_v26 = vpop.permute.xlu1 %555  ;;  %662 = vrot.lane.b32.xlu2 %v2438_v53, %s2021_s25 }
 0x110   : > { %598 = vrot.lane.b32.xlu0 %v2407_v60, %s2020_s24 }
 0x111   : > { %v2447_v16 = vpop.permute.xlu2 %625 }
 0x112   : > { %v1092_v34 = vld [vmem:[#allocation1] sm:$0xff]  ;;  %v527_v22 = vpop.permute.xlu0 %526 }
 0x113   : > { %1094 = vst [vmem:[#allocation1] ss:$9 sm:$0xff] %v948_v14  ;;  %1914 = vmatmul.msk.bf16.gmra.mxu1 %vm1224_vm9, %v1092_v34  ;;  %v769_v37 = vsel %vm755_vm4, %v740_v42, %v527_v22 }
 0x114   : > { %1096 = vst [vmem:[#allocation1 + $0x1] ss:$9 sm:$0xff] %v949_v32  ;;  %v798_v20 = vsel %vm784_vm5, %v769_v37, %v556_v26  ;;  %v605_v26 = vshrl.u32 %v575_v21, 16 }
 0x115   : > { %470 = vrot.lane.b32.xlu1 %v444_v59, %s2015_s19  ;;  %v827_v45 = vsel %vm813_vm6, %v798_v20, %v2402_v56  ;;  %v512_v59 = vrot.slane %v510_v41, 1 }
 0x117   : > { %v653_v43 = vpop.permute.xlu1 %652  ;;  %503 = vrot.lane.b32.xlu2 %v2407_v60, %s2014_s18  ;;  %v513_v54 = vor.u32 %v512_v59, %v508_v2 }
 0x118   : > { %428 = vrot.lane.b32.xlu0 %v2392_v47, %s2018_s22 }
 0x119   : > { %v2461_v35 = vpop.permute.xlu2 %462 }
 0x11a   : > { %v624_v49 = vpop.permute.xlu0 %623 }
 0x11b   : > { %v856_v50 = vsel %vm842_vm7, %v827_v45, %v624_v49 }
 0x11c   : > { %v885_v51 = vsel %vm871_vm8, %v856_v50, %v653_v43 }
 0x11d   : > { %v950_v33 = vrot.slane %v885_v51, 1  ;;  %v951_v40 = vrot.slane %v885_v51, 2  ;;  %v952_v52 = vrot.slane %v885_v51, 3  ;;  %1097 = vst [vmem:[#allocation1 + $0x2] ss:$9 sm:$0xff] %v885_v51  ;;  %567 = vrot.lane.b32.xlu1 %v2438_v53, %s2016_s20  ;;  %v953_v47 = vrot.slane %v885_v51, 4 }
 0x11e   : > { %v954_v58 = vrot.slane %v885_v51, 5  ;;  %v955_v31 = vrot.slane %v885_v51, 6 }
 0x11f   : > { %1099 = vst [vmem:[#allocation1 + $0x3] ss:$9 sm:$0xff] %v950_v33  ;;  %v494_v56 = vpop.permute.xlu1 %493  ;;  %600 = vrot.lane.b32.xlu2 %v2459_v44, %s2020_s24 }
 0x120   : > { %1101 = vst [vmem:[#allocation1 + $0x4] ss:$9 sm:$0xff] %v951_v40  ;;  %538 = vrot.lane.b32.xlu0 %v2429_v18, %s2017_s21 }
 0x121   : > { %1103 = vst [vmem:[#allocation1 + $0x5] ss:$9 sm:$0xff] %v952_v52  ;;  %v2479_v23 = vpop.permute.xlu2 %464 }
 0x122   : > { %1105 = vst [vmem:[#allocation1 + $0x6] ss:$9 sm:$0xff] %v953_v47  ;;  %v461_v63 = vpop.permute.xlu0 %460 }
 0x123   : > { %1107 = vst [vmem:[#allocation1 + $0x7] ss:$9 sm:$0xff] %v954_v58  ;;  %v713_v17 = vsel %vm697_vm2, %v684_v62, %v461_v63 }
 0x124   : > { %v742_v6 = vsel %vm726_vm3, %v713_v17, %v494_v56 }
 0x125   : > { %664 = vrot.lane.b32.xlu1 %v542_v61, %s2021_s25  ;;  %v771_v11 = vsel %vm755_vm4, %v742_v6, %v2431_v19  ;;  %v607_v19 = vshll.u32 %v575_v21, 16 }
 0x127   : > { %v591_v4 = vpop.permute.xlu1 %590  ;;  %430 = vrot.lane.b32.xlu2 %v2429_v18, %s2018_s22  ;;  %v609_v27 = vrot.slane %v607_v19, 1 }
 0x128   : > { %635 = vrot.lane.b32.xlu0 %v513_v54, %s2019_s23 }
 0x129   : > { %v560_v3 = vpop.permute.xlu2 %559  ;;  %v610_v34 = vor.u32 %v609_v27, %v605_v26 }
 0x12a   : > { %v1108_v0 = vld [vmem:[#allocation1] sm:$0xff]  ;;  %v558_v10 = vpop.permute.xlu0 %557 }
 0x12b   : > { %1110 = vst [vmem:[#allocation1] ss:$9 sm:$0xff] %v955_v31  ;;  %1915 = vmatmul.msk.bf16.gmra.mxu1 %vm1224_vm9, %v1108_v0  ;;  %v800_v8 = vsel %vm784_vm5, %v771_v11, %v558_v10 }
 0x12c   : > { %v829_v15 = vsel %vm813_vm6, %v800_v8, %v591_v4 }
 0x12d   : > { %505 = vrot.lane.b32.xlu1 %v2459_v44, %s2014_s18  ;;  %v858_v24 = vsel %vm842_vm7, %v829_v15, %v2447_v16 }
 0x12f   : > { %v421_v18 = vpop.permute.xlu1 %420  ;;  %540 = vrot.lane.b32.xlu2 %v513_v54, %s2017_s21 }
 0x130   : > { %472 = vrot.lane.b32.xlu0 %v2438_v53, %s2015_s19  ;;  %v686_v45 = vsel %vm668_vm1, %v2201_v57, %v421_v18 }
 0x131   : > { %v562_v37 = vpop.permute.xlu2 %561  ;;  %v715_v50 = vsel %vm697_vm2, %v686_v45, %v2461_v35 }
 0x132   : > { %v655_v7 = vpop.permute.xlu0 %654 }
 0x133   : > { %v887_v25 = vsel %vm871_vm8, %v858_v24, %v655_v7 }
 0x134   : > { %v956_v29 = vrot.slane %v887_v25, 1  ;;  %v957_v30 = vrot.slane %v887_v25, 2  ;;  %v958_v14 = vrot.slane %v887_v25, 3  ;;  %1111 = vst [vmem:[#allocation1 + $0x1] ss:$9 sm:$0xff] %v887_v25  ;;  %v959_v32 = vrot.slane %v887_v25, 4 }
 0x135   : > { %602 = vrot.lane.b32.xlu1 %v575_v21, %s2020_s24  ;;  %v960_v22 = vrot.slane %v887_v25, 5  ;;  %v961_v53 = vrot.slane %v887_v25, 6 }
 0x136   : > { %1113 = vst [vmem:[#allocation1 + $0x2] ss:$9 sm:$0xff] %v956_v29 }
 0x137   : > { %1115 = vst [vmem:[#allocation1 + $0x3] ss:$9 sm:$0xff] %v957_v30  ;;  %v496_v42 = vpop.permute.xlu1 %495  ;;  %637 = vrot.lane.b32.xlu2 %v610_v34, %s2019_s23 }
 0x138   : > { %1117 = vst [vmem:[#allocation1 + $0x4] ss:$9 sm:$0xff] %v958_v14  ;;  %569 = vrot.lane.b32.xlu0 %v542_v61, %s2016_s20  ;;  %v744_v33 = vsel %vm726_vm3, %v715_v50, %v496_v42 }
 0x139   : > { %1119 = vst [vmem:[#allocation1 + $0x5] ss:$9 sm:$0xff] %v959_v32  ;;  %v657_v20 = vpop.permute.xlu2 %656 }
 0x13a   : > { %1121 = vst [vmem:[#allocation1 + $0x6] ss:$9 sm:$0xff] %v960_v22  ;;  %v423_v16 = vpop.permute.xlu0 %422 }
 0x13b   : > { %1123 = vst [vmem:[#allocation1 + $0x7] ss:$9 sm:$0xff] %v961_v53  ;;  %v688_v47 = vsel %vm668_vm1, %v2248_v36, %v423_v16 }
 0x13c   : > { %v717_v35 = vsel %vm697_vm2, %v688_v47, %v2479_v23 }
 0x13f   : > { %v498_v39 = vpop.permute.xlu1 %497 }
 0x140   : > { %666 = vrot.lane.b32.xlu0 %v639_v38, %s2021_s25  ;;  %v746_v61 = vsel %vm726_vm3, %v717_v35, %v498_v39 }
 0x141   : > { %v425_v41 = vpop.permute.xlu2 %424 }
 0x142   : > { %v1124_v43 = vld [vmem:[#allocation1] sm:$0xff]  ;;  %v531_v44 = vpop.permute.xlu0 %530  ;;  %v690_v12 = vsel %vm668_vm1, %v2305_v9, %v425_v41 }
 0x143   : > { %1916 = vmatmul.msk.bf16.gmra.mxu1 %vm1224_vm9, %v1124_v43  ;;  %v773_v40 = vsel %vm755_vm4, %v744_v33, %v531_v44 }
 0x144   : > { %v802_v58 = vsel %vm784_vm5, %v773_v40, %v560_v3 }
 0x147   : > { %v593_v49 = vpop.permute.xlu1 %592 }
 0x148   : > { %v831_v56 = vsel %vm813_vm6, %v802_v58, %v593_v49  ;;  %v1264_v58 = vpop.f32.mrf.mxu0 }
 0x149   : > { %v535_v55 = vpop.permute.xlu2 %534 }
 0x14a   : > { %v533_v51 = vpop.permute.xlu0 %532 }
 0x14b   : > { %v775_v36 = vsel %vm755_vm4, %v746_v61, %v533_v51 }
 0x14c   : > { %v804_v1 = vsel %vm784_vm5, %v775_v36, %v562_v37 }
 0x14f   : > { %v595_v52 = vpop.permute.xlu1 %594 }
 0x150   : > { %v833_v23 = vsel %vm813_vm6, %v804_v1, %v595_v52 }
 0x151   : > { %v632_v11 = vpop.permute.xlu2 %631 }
 0x152   : > { %v628_v2 = vpop.permute.xlu0 %627 }
 0x153   : > { %v860_v57 = vsel %vm842_vm7, %v831_v56, %v628_v2 }
 0x154   : > { %v889_v59 = vsel %vm871_vm8, %v860_v57, %v657_v20 }
 0x155   : > { %v962_v62 = vrot.slane %v889_v59, 1  ;;  %v963_v63 = vrot.slane %v889_v59, 2  ;;  %v964_v54 = vrot.slane %v889_v59, 3  ;;  %1125 = vst [vmem:[#allocation1] ss:$9 sm:$0xff] %v889_v59  ;;  %v965_v48 = vrot.slane %v889_v59, 4 }
 0x156   : > { %v966_v17 = vrot.slane %v889_v59, 5  ;;  %v967_v5 = vrot.slane %v889_v59, 6 }
 0x157   : > { %1127 = vst [vmem:[#allocation1 + $0x1] ss:$9 sm:$0xff] %v962_v62  ;;  %v659_v4 = vpop.permute.xlu1 %658 }
 0x158   : > { %1129 = vst [vmem:[#allocation1 + $0x2] ss:$9 sm:$0xff] %v963_v63 }
 0x159   : > { %1131 = vst [vmem:[#allocation1 + $0x3] ss:$9 sm:$0xff] %v964_v54  ;;  %v469_v9 = vpop.permute.xlu2 %468  ;;  %v1266_v54 = vpop.f32.mrf.mxu0 }
 0x15a   : > { %1133 = vst [vmem:[#allocation1 + $0x4] ss:$9 sm:$0xff] %v965_v48  ;;  %v630_v6 = vpop.permute.xlu0 %629 }
 0x15b   : > { %1135 = vst [vmem:[#allocation1 + $0x5] ss:$9 sm:$0xff] %v966_v17  ;;  %v862_v31 = vsel %vm842_vm7, %v833_v23, %v630_v6 }
 0x15c   : > { %1137 = vst [vmem:[#allocation1 + $0x6] ss:$9 sm:$0xff] %v967_v5  ;;  %v891_v0 = vsel %vm871_vm8, %v862_v31, %v659_v4 }
 0x15d   : > { %1138 = vst [vmem:[#allocation1 + $0x7] ss:$9 sm:$0xff] %v891_v0  ;;  %v968_v8 = vrot.slane %v891_v0, 1  ;;  %v969_v3 = vrot.slane %v891_v0, 2  ;;  %v970_v18 = vrot.slane %v891_v0, 3  ;;  %v971_v19 = vrot.slane %v891_v0, 4 }
 0x15e   : > { %v972_v24 = vrot.slane %v891_v0, 5  ;;  %v973_v25 = vrot.slane %v891_v0, 6 }
 0x15f   : > { %v500_v10 = vpop.permute.xlu1 %499 }
 0x161   : > { %v566_v42 = vpop.permute.xlu2 %565 }
 0x162   : > { %v467_v13 = vpop.permute.xlu0 %466 }
 0x163   : > { %v719_v21 = vsel %vm697_vm2, %v690_v12, %v467_v13 }
 0x164   : > { %v1139_v15 = vld [vmem:[#allocation1] sm:$0xff]  ;;  %v748_v26 = vsel %vm726_vm3, %v719_v21, %v500_v10 }
 0x165   : > { %1141 = vst [vmem:[#allocation1] ss:$9 sm:$0xff] %v968_v8  ;;  %1917 = vmatmul.msk.bf16.vlgmr.msra.gmra.mxu2 %vm1224_vm9, %v1139_v15  ;;  %v777_v29 = vsel %vm755_vm4, %v748_v26, %v535_v55 }
 0x166   : > { %1143 = vst [vmem:[#allocation1 + $0x1] ss:$9 sm:$0xff] %v969_v3 }
 0x167   : > { %1145 = vst [vmem:[#allocation1 + $0x2] ss:$9 sm:$0xff] %v970_v18  ;;  %v597_v7 = vpop.permute.xlu1 %596 }
 0x168   : > { %1147 = vst [vmem:[#allocation1 + $0x3] ss:$9 sm:$0xff] %v971_v19 }
 0x169   : > { %1149 = vst [vmem:[#allocation1 + $0x4] ss:$9 sm:$0xff] %v972_v24  ;;  %v663_v50 = vpop.permute.xlu2 %662 }
 0x16a   : > { %1151 = vst [vmem:[#allocation1 + $0x5] ss:$9 sm:$0xff] %v973_v25  ;;  %v564_v27 = vpop.permute.xlu0 %563 }
 0x16b   : > { %v806_v30 = vsel %vm784_vm5, %v777_v29, %v564_v27 }
 0x16c   : > { %v835_v14 = vsel %vm813_vm6, %v806_v30, %v597_v7 }
 0x16d   : > { %v864_v34 = vsel %vm842_vm7, %v835_v14, %v632_v11  ;;  %v2556_v11 = vld [vmem:[%s2804_s2] ss:$0 sm:$0xff] }
 0x16e   : > { %v2560_v8 = vadd.f32 %v2556_v11, %v1266_v54 }
 0x16f   : > { %v427_v32 = vpop.permute.xlu1 %426 }
 0x170   : > { %v692_v16 = vsel %vm668_vm1, %v2336_v46, %v427_v32  ;;  %v1354_v24 = vmul.f32 0.044715, %v2560_v8 }
 0x171   : > { %v721_v39 = vsel %vm697_vm2, %v692_v16, %v469_v9  ;;  %v504_v62 = vpop.permute.xlu2 %503  ;;  %v2567_v9 = vadd.f32 %v2556_v11, %v1264_v58 }
 0x172   : > { %v661_v22 = vpop.permute.xlu0 %660  ;;  %v1379_v29 = vmul.f32 %v1354_v24, %v2560_v8 }
 0x173   : > { %v893_v53 = vsel %vm871_vm8, %v864_v34, %v661_v22  ;;  %v1353_v34 = vmul.f32 0.044715, %v2567_v9 }
 0x174   : > { %v974_v37 = vrot.slane %v893_v53, 1  ;;  %1152 = vst [vmem:[#allocation1 + $0x6] ss:$9 sm:$0xff] %v893_v53  ;;  %v975_v43 = vrot.slane %v893_v53, 2  ;;  %v976_v45 = vrot.slane %v893_v53, 3  ;;  %v977_v51 = vrot.slane %v893_v53, 4 }
 0x175   : > { %v978_v41 = vrot.slane %v893_v53, 5  ;;  %v979_v46 = vrot.slane %v893_v53, 6 }
 0x176   : > { %1154 = vst [vmem:[#allocation1 + $0x7] ss:$9 sm:$0xff] %v974_v37 }
 0x177   : > { %v537_v38 = vpop.permute.xlu1 %536 }
 0x179   : > { %v601_v1 = vpop.permute.xlu2 %600 }
 0x17a   : > { %v502_v20 = vpop.permute.xlu0 %501 }
 0x17b   : > { %v750_v44 = vsel %vm726_vm3, %v721_v39, %v502_v20  ;;  %v1378_v39 = vmul.f32 %v1353_v34, %v2567_v9 }
 0x17c   : > { %v779_v33 = vsel %vm755_vm4, %v750_v44, %v537_v38 }
 0x17d   : > { %v1155_v49 = vld [vmem:[#allocation1] sm:$0xff]  ;;  %v808_v52 = vsel %vm784_vm5, %v779_v33, %v566_v42  ;;  %v1279_v53 = vpop.f32.mrf.mxu1  ;;  %v1404_v42 = vmul.f32 %v1379_v29, %v2560_v8 }
 0x17e   : > { %1157 = vst [vmem:[#allocation1] ss:$9 sm:$0xff] %v975_v43  ;;  %1918 = vmatmul.msk.bf16.gmra.mxu2 %vm1224_vm9, %v1155_v49 }
 0x17f   : > { %1159 = vst [vmem:[#allocation1 + $0x1] ss:$9 sm:$0xff] %v976_v45  ;;  %v634_v40 = vpop.permute.xlu1 %633 }
 0x180   : > { %1161 = vst [vmem:[#allocation1 + $0x2] ss:$9 sm:$0xff] %v977_v51 }
 0x181   : > { %1163 = vst [vmem:[#allocation1 + $0x3] ss:$9 sm:$0xff] %v978_v41  ;;  %v431_v21 = vpop.permute.xlu2 %430 }
 0x182   : > { %1165 = vst [vmem:[#allocation1 + $0x4] ss:$9 sm:$0xff] %v979_v46  ;;  %v599_v47 = vpop.permute.xlu0 %598  ;;  %v696_v30 = vsel %vm668_vm1, %v2407_v60, %v431_v21 }
 0x183   : > { %v837_v56 = vsel %vm813_vm6, %v808_v52, %v599_v47 }
 0x184   : > { %v866_v2 = vsel %vm842_vm7, %v837_v56, %v634_v40  ;;  %v1403_v40 = vmul.f32 %v1378_v39, %v2567_v9 }
 0x185   : > { %v895_v57 = vsel %vm871_vm8, %v866_v2, %v663_v50  ;;  %v1429_v50 = vadd.f32 %v1404_v42, %v2560_v8 }
 0x186   : > { %1166 = vst [vmem:[#allocation1 + $0x5] ss:$9 sm:$0xff] %v895_v57  ;;  %v980_v35 = vrot.slane %v895_v57, 1  ;;  %v981_v59 = vrot.slane %v895_v57, 2  ;;  %v982_v48 = vrot.slane %v895_v57, 3  ;;  %v983_v4 = vrot.slane %v895_v57, 4 }
 0x187   : > { %v471_v61 = vpop.permute.xlu1 %470  ;;  %v984_v23 = vrot.slane %v895_v57, 5  ;;  %v985_v31 = vrot.slane %v895_v57, 6  ;;  %v1454_v56 = vmul.f32 0.7978846, %v1429_v50 }
 0x188   : > { %1168 = vst [vmem:[#allocation1 + $0x6] ss:$9 sm:$0xff] %v980_v35  ;;  %v2595_v35 = vpop.f32.mrf.mxu1 }
 0x189   : > { %1170 = vst [vmem:[#allocation1 + $0x7] ss:$9 sm:$0xff] %v981_v59  ;;  %v541_v38 = vpop.permute.xlu2 %540  ;;  %v1428_v59 = vadd.f32 %v1403_v40, %v2567_v9  ;;  %1955 = vtanh.f32 %v1454_v56 }
 0x18a   : > { %v429_v63 = vpop.permute.xlu0 %428 }
 0x18b   : > { %v694_v55 = vsel %vm668_vm1, %v2372_v28, %v429_v63  ;;  %v1269_v28 = vpop.f32.mrf.mxu0 }
 0x18c   : > { %v723_v17 = vsel %vm697_vm2, %v694_v55, %v471_v61  ;;  %v2574_v22 = vadd.f32 %v2556_v11, %v1269_v28 }
 0x18d   : > { %v752_v0 = vsel %vm726_vm3, %v723_v17, %v504_v62 }
 0x18e   : > { %v1355_v60 = vmul.f32 0.044715, %v2574_v22  ;;  %v1330_v40 = vmul.f32 0.5, %v2574_v22 }
 0x18f   : > { %v568_v36 = vpop.permute.xlu1 %567 }
 0x190   : > { %v1171_v5 = vld [vmem:[#allocation1] sm:$0xff]  ;;  %v1380_v46 = vmul.f32 %v1355_v60, %v2574_v22 }
 0x191   : > { %1173 = vst [vmem:[#allocation1] ss:$9 sm:$0xff] %v982_v48  ;;  %1919 = vmatmul.msk.bf16.gmra.mxu2 %vm1224_vm9, %v1171_v5  ;;  %v638_v63 = vpop.permute.xlu2 %637 }
 0x192   : > { %v539_v6 = vpop.permute.xlu0 %538  ;;  %1175 = vst [vmem:[#allocation1 + $0x1] ss:$9 sm:$0xff] %v983_v4  ;;  %v1405_v61 = vmul.f32 %v1380_v46, %v2574_v22  ;;  %v1453_v4 = vmul.f32 0.7978846, %v1428_v59 }
 0x193   : > { %1177 = vst [vmem:[#allocation1 + $0x2] ss:$9 sm:$0xff] %v984_v23  ;;  %v781_v10 = vsel %vm755_vm4, %v752_v0, %v539_v6  ;;  %v1271_v27 = vpop.f32.mrf.mxu0 }
 0x194   : > { %1179 = vst [vmem:[#allocation1 + $0x3] ss:$9 sm:$0xff] %v985_v31  ;;  %v810_v12 = vsel %vm784_vm5, %v781_v10, %v568_v36  ;;  %v2578_v37 = vadd.f32 %v2556_v11, %v1271_v27  ;;  %v1430_v5 = vadd.f32 %v1405_v61, %v2574_v22  ;;  %1957 = vtanh.f32 %v1453_v4 }
 0x195   : > { %v839_v3 = vsel %vm813_vm6, %v810_v12, %v601_v1  ;;  %v2642_v22 = vadd.f32 %v2556_v11, %v2595_v35 }
 0x196   : > { %v1356_v51 = vmul.f32 0.044715, %v2578_v37 }
 0x197   : > { %v665_v13 = vpop.permute.xlu1 %664  ;;  %v1360_v4 = vmul.f32 0.044715, %v2642_v22 }
 0x198   : > { %v1381_v2 = vmul.f32 %v1356_v51, %v2578_v37 }
 0x19a   : > { %v636_v15 = vpop.permute.xlu0 %635  ;;  %v1406_v54 = vmul.f32 %v1381_v2, %v2578_v37 }
 0x19b   : > { %v868_v18 = vsel %vm842_vm7, %v839_v3, %v636_v15  ;;  %v1274_v20 = vpop.f32.mrf.mxu0  ;;  %v1956_v3 = vpop.eup %1955  ;;  %v1455_v15 = vmul.f32 0.7978846, %v1430_v5 }
 0x19c   : > { %v897_v19 = vsel %vm871_vm8, %v868_v18, %v665_v13  ;;  %v2593_v57 = vadd.f32 %v2556_v11, %v1274_v20  ;;  %v1431_v10 = vadd.f32 %v1406_v54, %v2578_v37  ;;  %v1284_v13 = vpop.f32.mrf.mxu1  ;;  %v1504_v24 = vadd.f32 1.0, %v1956_v3  ;;  %v1958_v29 = vpop.eup %1957 }
 0x19d   : > { %v986_v7 = vrot.slane %v897_v19, 1  ;;  %v987_v25 = vrot.slane %v897_v19, 2  ;;  %1180 = vst [vmem:[#allocation1 + $0x4] ss:$9 sm:$0xff] %v897_v19  ;;  %v988_v26 = vrot.slane %v897_v19, 3  ;;  %v989_v43 = vrot.slane %v897_v19, 4 }
 0x19e   : > { %v990_v44 = vrot.slane %v897_v19, 5  ;;  %v991_v41 = vrot.slane %v897_v19, 6  ;;  %v1357_v36 = vmul.f32 0.044715, %v2593_v57  ;;  %v1456_v21 = vmul.f32 0.7978846, %v1431_v10 }
 0x19f   : > { %1182 = vst [vmem:[#allocation1 + $0x5] ss:$9 sm:$0xff] %v986_v7  ;;  %v506_v32 = vpop.permute.xlu1 %505  ;;  %v2612_v19 = vadd.f32 %v2556_v11, %v1279_v53  ;;  %1959 = vtanh.f32 %v1455_v15  ;;  %v1503_v39 = vadd.f32 1.0, %v1958_v29  ;;  %v1385_v10 = vmul.f32 %v1360_v4, %v2642_v22 }
 0x1a0   : > { %1184 = vst [vmem:[#allocation1 + $0x6] ss:$9 sm:$0xff] %v987_v25  ;;  %v1382_v12 = vmul.f32 %v1357_v36, %v2593_v57  ;;  %v1329_v25 = vmul.f32 0.5, %v2560_v8  ;;  %1961 = vtanh.f32 %v1456_v21 }
 0x1a1   : > { %1186 = vst [vmem:[#allocation1 + $0x7] ss:$9 sm:$0xff] %v988_v26  ;;  %v1359_v27 = vmul.f32 0.044715, %v2612_v19 }
 0x1a2   : > { %v473_v14 = vpop.permute.xlu0 %472  ;;  %v1407_v7 = vmul.f32 %v1382_v12, %v2593_v57 }
 0x1a3   : > { %v725_v16 = vsel %vm697_vm2, %v696_v30, %v473_v14  ;;  %v1276_v55 = vpop.f32.mrf.mxu0  ;;  %v2618_v30 = vmul.f32 %v1504_v24, %v1329_v25  ;;  %v1384_v8 = vmul.f32 %v1359_v27, %v2612_v19 }
 0x1a4   : > { %v754_v49 = vsel %vm726_vm3, %v725_v16, %v506_v32  ;;  %v2606_v23 = vadd.f32 %v2556_v11, %v1276_v55  ;;  %v1432_v14 = vadd.f32 %v1407_v7, %v2593_v57  ;;  %v1286_v53 = vpop.f32.mrf.mxu1 }
 0x1a5   : > { %v783_v52 = vsel %vm755_vm4, %v754_v49, %v541_v38  ;;  %v1960_v38 = vpop.eup %1959  ;;  %v1581_v60 = vrot.slane %v2618_v30, 2 }
 0x1a6   : > { %v1358_v18 = vmul.f32 0.044715, %v2606_v23  ;;  %v1457_v20 = vmul.f32 0.7978846, %v1432_v14  ;;  %v1505_v49 = vadd.f32 1.0, %v1960_v38  ;;  %v1333_v25 = vmul.f32 0.5, %v2606_v23 }
 0x1a7   : > { %v603_v58 = vpop.permute.xlu1 %602 }
 0x1a8   : > { %v1187_v45 = vld [vmem:[#allocation1] sm:$0xff]  ;;  %v1383_v26 = vmul.f32 %v1358_v18, %v2606_v23  ;;  %1963 = vtanh.f32 %v1457_v20 }
 0x1a9   : > { %1189 = vst [vmem:[#allocation1] ss:$9 sm:$0xff] %v989_v43  ;;  %1920 = vmatmul.msk.bf16.gmra.mxu2 %vm1224_vm9, %v1187_v45  ;;  %v1962_v43 = vpop.eup %1961  ;;  %v1582_v45 = vrot.slane %v2618_v30, 4 }
 0x1aa   : > { %1191 = vst [vmem:[#allocation1 + $0x1] ss:$9 sm:$0xff] %v990_v44  ;;  %v570_v33 = vpop.permute.xlu0 %569  ;;  %v1408_v34 = vmul.f32 %v1383_v26, %v2606_v23  ;;  %v1328_v44 = vmul.f32 0.5, %v2567_v9  ;;  %v1506_v46 = vadd.f32 1.0, %v1962_v43  ;;  %v1530_v9 = vmul.f32 %v1505_v49, %v1330_v40 }
 0x1ab   : > { %1193 = vst [vmem:[#allocation1 + $0x2] ss:$9 sm:$0xff] %v991_v41  ;;  %v812_v47 = vsel %vm784_vm5, %v783_v52, %v570_v33  ;;  %v1409_v41 = vmul.f32 %v1384_v8, %v2612_v19  ;;  %v2631_v33 = vadd.f32 %v2556_v11, %v1284_v13  ;;  %v1331_v52 = vmul.f32 0.5, %v2578_v37 }
 0x1ac   : > { %v841_v62 = vsel %vm813_vm6, %v812_v47, %v603_v58  ;;  %v1433_v50 = vadd.f32 %v1408_v34, %v2606_v23  ;;  %v1528_v51 = vmul.f32 %v1503_v39, %v1328_v44  ;;  %v1289_v58 = vpop.f32.mrf.mxu1  ;;  %v1586_v55 = vrot.slane %v1530_v9, 6 }
 0x1ad   : > { %v870_v48 = vsel %vm842_vm7, %v841_v62, %v638_v63  ;;  %v1434_v2 = vadd.f32 %v1409_v41, %v2612_v19  ;;  %v1361_v59 = vmul.f32 0.044715, %v2631_v33  ;;  %v2638_v63 = vmul.f32 %v1506_v46, %v1331_v52 }
 0x1ae   : > { %v1458_v47 = vmul.f32 0.7978846, %v1433_v50  ;;  %v1578_v56 = vrot.slane %v1528_v51, 2  ;;  %v1579_v62 = vrot.slane %v1528_v51, 4  ;;  %v1580_v54 = vrot.slane %v1528_v51, 6  ;;  %v1964_v37 = vpop.eup %1963 }
 0x1af   : > { %v1587_v35 = vrot.slane %v2638_v63, 2  ;;  %v1507_v5 = vadd.f32 1.0, %v1964_v37  ;;  %v1583_v13 = vrot.slane %v2618_v30, 6  ;;  %v1585_v7 = vrot.slane %v1530_v9, 4 }
 0x1b0   : > { %1965 = vtanh.f32 %v1458_v47  ;;  %v1410_v26 = vmul.f32 %v1385_v10, %v2642_v22  ;;  %v1588_v43 = vrot.slane %v2638_v63, 4  ;;  %v1589_v50 = vrot.slane %v2638_v63, 6 }
 0x1b2   : > { %v667_v17 = vpop.permute.xlu0 %666 }
 0x1b3   : > { %v899_v1 = vsel %vm871_vm8, %v870_v48, %v667_v17  ;;  %v1459_v48 = vmul.f32 0.7978846, %v1434_v2  ;;  %v1386_v17 = vmul.f32 %v1361_v59, %v2631_v33 }
 0x1b4   : > { %v992_v6 = vrot.slane %v899_v1, 1  ;;  %v993_v31 = vrot.slane %v899_v1, 2  ;;  %v994_v0 = vrot.slane %v899_v1, 3  ;;  %1194 = vst [vmem:[#allocation1 + $0x3] ss:$9 sm:$0xff] %v899_v1  ;;  %v995_v28 = vrot.slane %v899_v1, 4  ;;  %v1291_v12 = vpop.f32.mrf.mxu1 }
 0x1b5   : > { %v996_v32 = vrot.slane %v899_v1, 5  ;;  %v997_v42 = vrot.slane %v899_v1, 6  ;;  %v2654_v1 = vadd.f32 %v2556_v11, %v1286_v53  ;;  %1967 = vtanh.f32 %v1459_v48 }
 0x1b6   : > { %1196 = vst [vmem:[#allocation1 + $0x4] ss:$9 sm:$0xff] %v992_v6  ;;  %v1332_v6 = vmul.f32 0.5, %v2593_v57  ;;  %v1584_v57 = vrot.slane %v1530_v9, 2  ;;  %v2676_v8 = vadd.f32 %v2556_v11, %v1291_v12  ;;  %v1336_v48 = vmul.f32 0.5, %v2631_v33 }
 0x1b7   : > { %1198 = vst [vmem:[#allocation1 + $0x5] ss:$9 sm:$0xff] %v993_v31  ;;  %v1411_v31 = vmul.f32 %v1386_v17, %v2631_v33  ;;  %v1362_v15 = vmul.f32 0.044715, %v2654_v1 }
 0x1b8   : > { %1200 = vst [vmem:[#allocation1 + $0x6] ss:$9 sm:$0xff] %v994_v0  ;;  %v1966_v0 = vpop.eup %1965  ;;  %v1532_v3 = vmul.f32 %v1507_v5, %v1332_v6 }
 0x1b9   : > { %1202 = vst [vmem:[#allocation1 + $0x7] ss:$9 sm:$0xff] %v995_v28  ;;  %v2662_v28 = vadd.f32 %v2556_v11, %v1289_v58  ;;  %v1508_v21 = vadd.f32 1.0, %v1966_v0  ;;  %v1436_v24 = vadd.f32 %v1411_v31, %v2631_v33  ;;  %v1387_v34 = vmul.f32 %v1362_v15, %v2654_v1 }
 0x1ba   : > { %v1591_v14 = vrot.slane %v1532_v3, 4 }
 0x1bb   : > { %v1363_v27 = vmul.f32 0.044715, %v2662_v28  ;;  %v1968_v29 = vpop.eup %1967  ;;  %v2671_v53 = vmul.f32 %v1508_v21, %v1333_v25  ;;  %v1412_v20 = vmul.f32 %v1387_v34, %v2654_v1 }
 0x1bc   : > { %v1509_v23 = vadd.f32 1.0, %v1968_v29 }
 0x1bd   : > { %v1388_v38 = vmul.f32 %v1363_v27, %v2662_v28  ;;  %v1437_v40 = vadd.f32 %v1412_v20, %v2654_v1  ;;  %v1593_v4 = vrot.slane %v2671_v53, 2  ;;  %v1594_v6 = vrot.slane %v2671_v53, 4 }
 0x1be   : > { %v1595_v10 = vrot.slane %v2671_v53, 6 }
 0x1bf   : > { %v1413_v49 = vmul.f32 %v1388_v38, %v2662_v28 }
 0x1c0   : > { %v1203_v16 = vld [vmem:[#allocation1] sm:$0xff]  ;;  %v1294_v39 = vpop.f32.mrf.mxu1 }
 0x1c1   : > { %1205 = vst [vmem:[#allocation1] ss:$9 sm:$0xff] %v996_v32  ;;  %1921 = vmatmul.msk.bf16.vlgmr.msra.gmra.mxu3 %vm1224_vm9, %v1203_v16  ;;  %v1592_v32 = vrot.slane %v1532_v3, 6  ;;  %v1435_v16 = vadd.f32 %v1410_v26, %v2642_v22  ;;  %v2689_v46 = vadd.f32 %v2556_v11, %v1294_v39  ;;  %v1438_v52 = vadd.f32 %v1413_v49, %v2662_v28 }
 0x1c2   : > { %1207 = vst [vmem:[#allocation1 + $0x1] ss:$9 sm:$0xff] %v997_v42  ;;  %v1461_v42 = vmul.f32 0.7978846, %v1436_v24 }
 0x1c3   : > { %1659 = vst [vmem:[#allocation1 + $0x20] ss:$4 sm:$0xff] %v2618_v30  ;;  %v1463_v37 = vmul.f32 0.7978846, %v1438_v52 }
 0x1c4   : > { %1661 = vst [vmem:[#allocation1 + $0x21] ss:$4 sm:$0xff] %v1581_v60  ;;  %v1334_v60 = vmul.f32 0.5, %v2612_v19  ;;  %1969 = vtanh.f32 %v1461_v42  ;;  %v1590_v19 = vrot.slane %v1532_v3, 2 }
 0x1c5   : > { %1663 = vst [vmem:[#allocation1 + $0x22] ss:$4 sm:$0xff] %v1582_v45  ;;  %v1460_v45 = vmul.f32 0.7978846, %v1435_v16  ;;  %v1338_v16 = vmul.f32 0.5, %v2662_v28 }
 0x1c6   : > { %v1534_v44 = vmul.f32 %v1509_v23, %v1334_v60 }
 0x1c7   : > { %1971 = vtanh.f32 %v1460_v45 }
 0x1c8   : > { %v1598_v59 = vrot.slane %v1534_v44, 6 }
 0x1c9   : > { %v1208_v61 = vld [vmem:[#allocation1] sm:$0xff] }
 0x1ca   : > { %1651 = vst [vmem:[#allocation1] ss:$4 sm:$0xff] %v1528_v51  ;;  %v1364_v51 = vmul.f32 0.044715, %v2676_v8  ;;  %v1970_v58 = vpop.eup %1969 }
 0x1cb   : > { %1653 = vst [vmem:[#allocation1 + $0x1] ss:$4 sm:$0xff] %v1578_v56  ;;  %v1597_v56 = vrot.slane %v1534_v44, 4 }
 0x1cc   : > { %1655 = vst [vmem:[#allocation1 + $0x2] ss:$4 sm:$0xff] %v1579_v62  ;;  %v1665_v36 = vld.sshfl [vmem:[#allocation1 + $0x20] sm:$0xff pattern:$0x73625140]  ;;  %v1389_v2 = vmul.f32 %v1364_v51, %v2676_v8  ;;  %v1296_v62 = vpop.f32.mrf.mxu1 }
 0x1cd   : > { %1657 = vst [vmem:[#allocation1 + $0x3] ss:$4 sm:$0xff] %v1580_v54  ;;  %v1511_v54 = vadd.f32 1.0, %v1970_v58 }
 0x1ce   : > { %1670 = vst [vmem:[#allocation1 + $0x20] ss:$4 sm:$0xff] %v1586_v55  ;;  %v1414_v55 = vmul.f32 %v1389_v2, %v2676_v8 }
 0x1cf   : > { %1671 = vst [vmem:[#allocation1 + $0x21] ss:$4 sm:$0xff] %v2638_v63  ;;  %v1365_v63 = vmul.f32 0.044715, %v2689_v46  ;;  %v2704_v31 = vmul.f32 %v1511_v54, %v1336_v48 }
 0x1d0   : > { %1672 = vst [vmem:[#allocation1 + $0x22] ss:$4 sm:$0xff] %v1587_v35  ;;  %v1972_v35 = vpop.eup %1971  ;;  %v1439_v12 = vadd.f32 %v1414_v55, %v2676_v8 }
 0x1d1   : > { %1812 = vst [vmem:[%s2648_s10 + $0x8] sm:$0x3f] %v1665_v36  ;;  %1922 = vmatmul.msk.bf16.gmra.mxu3 %vm1224_vm9, %v1208_v61  ;;  %v1462_v61 = vmul.f32 0.7978846, %v1437_v40  ;;  %v2697_v36 = vadd.f32 %v2556_v11, %v1296_v62  ;;  %v1390_v5 = vmul.f32 %v1365_v63, %v2689_v46  ;;  %v1602_v21 = vrot.slane %v2704_v31, 2 }
 0x1d2   : > { %v1464_v24 = vmul.f32 0.7978846, %v1439_v12  ;;  %v1603_v27 = vrot.slane %v2704_v31, 4 }
 0x1d3   : > { %1973 = vtanh.f32 %v1462_v61  ;;  %v1366_v33 = vmul.f32 0.044715, %v2697_v36  ;;  %v1415_v15 = vmul.f32 %v1390_v5, %v2689_v46 }
 0x1d4   : > { %v1664_v18 = vld.sshfl [vmem:[#allocation1] sm:$0xff pattern:$0x73625140]  ;;  %1975 = vtanh.f32 %v1463_v37  ;;  %v1340_v37 = vmul.f32 0.5, %v2689_v46 }
 0x1d5   : > { %1666 = vst [vmem:[#allocation1] ss:$4 sm:$0xff] %v1583_v13  ;;  %v1510_v13 = vadd.f32 1.0, %v1972_v35  ;;  %1977 = vtanh.f32 %v1464_v24 }
 0x1d6   : > { %1667 = vst [vmem:[#allocation1 + $0x1] ss:$4 sm:$0xff] %v1530_v9  ;;  %v1596_v9 = vrot.slane %v1534_v44, 2 }
 0x1d7   : > { %1668 = vst [vmem:[#allocation1 + $0x2] ss:$4 sm:$0xff] %v1584_v57  ;;  %v1674_v30 = vld.sshfl [vmem:[#allocation1 + $0x20] sm:$0xff pattern:$0x73625140]  ;;  %v1335_v57 = vmul.f32 0.5, %v2642_v22 }
 0x1d8   : > { %1669 = vst [vmem:[#allocation1 + $0x3] ss:$4 sm:$0xff] %v1585_v7  ;;  %v1391_v7 = vmul.f32 %v1366_v33, %v2697_v36  ;;  %v1341_v33 = vmul.f32 0.5, %v2697_v36 }
 0x1d9   : > { %1679 = vst [vmem:[#allocation1 + $0x20] ss:$4 sm:$0xff] %v1591_v14  ;;  %v1535_v26 = vmul.f32 %v1510_v13, %v1335_v57  ;;  %v1440_v14 = vadd.f32 %v1415_v15, %v2689_v46 }
 0x1da   : > { %1680 = vst [vmem:[#allocation1 + $0x21] ss:$4 sm:$0xff] %v1592_v32  ;;  %v1416_v34 = vmul.f32 %v1391_v7, %v2697_v36 }
 0x1db   : > { %1681 = vst [vmem:[#allocation1 + $0x22] ss:$4 sm:$0xff] %v2671_v53  ;;  %v1599_v42 = vrot.slane %v1535_v26, 2  ;;  %v1465_v39 = vmul.f32 0.7978846, %v1440_v14  ;;  %v1600_v60 = vrot.slane %v1535_v26, 4 }
 0x1dc   : > { %1811 = vst [vmem:[%s2648_s10] sm:$0xff] %v1664_v18  ;;  %v1974_v18 = vpop.eup %1973  ;;  %v1601_v20 = vrot.slane %v1535_v26, 6 }
 0x1dd   : > { %1814 = vst [vmem:[%s2648_s10 + $0x18] sm:$0x3f] %v1674_v30  ;;  %v1976_v25 = vpop.eup %1975  ;;  %v1512_v29 = vadd.f32 1.0, %v1974_v18  ;;  %v1337_v30 = vmul.f32 0.5, %v2654_v1  ;;  %1979 = vtanh.f32 %v1465_v39 }
 0x1de   : > { %v1513_v32 = vadd.f32 1.0, %v1976_v25  ;;  %v1978_v45 = vpop.eup %1977 }
 0x1df   : > { %v1673_v41 = vld.sshfl [vmem:[#allocation1] sm:$0xff pattern:$0x73625140]  ;;  %v1537_v23 = vmul.f32 %v1512_v29, %v1337_v30 }
 0x1e0   : > { %1675 = vst [vmem:[#allocation1] ss:$4 sm:$0xff] %v1588_v43  ;;  %v2725_v43 = vmul.f32 %v1513_v32, %v1338_v16 }
 0x1e1   : > { %1676 = vst [vmem:[#allocation1 + $0x1] ss:$4 sm:$0xff] %v1589_v50  ;;  %v1607_v49 = vrot.slane %v1537_v23, 6  ;;  %v1605_v61 = vrot.slane %v1537_v23, 2  ;;  %v1606_v62 = vrot.slane %v1537_v23, 4 }
 0x1e2   : > { %1677 = vst [vmem:[#allocation1 + $0x2] ss:$4 sm:$0xff] %v1532_v3  ;;  %v1683_v47 = vld.sshfl [vmem:[#allocation1 + $0x20] sm:$0xff pattern:$0x73625140]  ;;  %v1610_v57 = vrot.slane %v2725_v43, 6 }
 0x1e3   : > { %1678 = vst [vmem:[#allocation1 + $0x3] ss:$4 sm:$0xff] %v1590_v19  ;;  %v1514_v19 = vadd.f32 1.0, %v1978_v45  ;;  %v1980_v58 = vpop.eup %1979 }
 0x1e4   : > { %1688 = vst [vmem:[#allocation1 + $0x20] ss:$4 sm:$0xff] %v1596_v9  ;;  %v1339_v9 = vmul.f32 0.5, %v2676_v8  ;;  %v1515_v63 = vadd.f32 1.0, %v1980_v58 }
 0x1e5   : > { %1689 = vst [vmem:[#allocation1 + $0x21] ss:$4 sm:$0xff] %v1597_v56  ;;  %v1604_v56 = vrot.slane %v2704_v31, 6 }
 0x1e6   : > { %1690 = vst [vmem:[#allocation1 + $0x22] ss:$4 sm:$0xff] %v1598_v59  ;;  %v1539_v2 = vmul.f32 %v1514_v19, %v1339_v9 }
 0x1e7   : > { %1813 = vst [vmem:[%s2648_s10 + $0x10] sm:$0xff] %v1673_v41  ;;  %v1608_v41 = vrot.slane %v2725_v43, 2 }
 0x1e8   : > { %1816 = vst [vmem:[%s2648_s10 + $0x28] sm:$0x3f] %v1683_v47  ;;  %v1299_v17 = vpop.f32.mrf.mxu2  ;;  %v1612_v55 = vrot.slane %v1539_v2, 4 }
 0x1e9   : > { %v2730_v50 = vadd.f32 %v2556_v11, %v1299_v17 }
 0x1ea   : > { %v1682_v0 = vld.sshfl [vmem:[#allocation1] sm:$0xff pattern:$0x73625140] }
 0x1eb   : > { %1684 = vst [vmem:[#allocation1] ss:$4 sm:$0xff] %v1593_v4  ;;  %v1367_v52 = vmul.f32 0.044715, %v2730_v50  ;;  %v1613_v4 = vrot.slane %v1539_v2, 6 }
 0x1ec   : > { %1685 = vst [vmem:[#allocation1 + $0x1] ss:$4 sm:$0xff] %v1594_v6  ;;  %v1540_v6 = vmul.f32 %v1515_v63, %v1340_v37 }
 0x1ed   : > { %1686 = vst [vmem:[#allocation1 + $0x2] ss:$4 sm:$0xff] %v1595_v10  ;;  %v1692_v3 = vld.sshfl [vmem:[#allocation1 + $0x20] sm:$0xff pattern:$0x73625140]  ;;  %v1392_v54 = vmul.f32 %v1367_v52, %v2730_v50 }
 0x1ee   : > { %1687 = vst [vmem:[#allocation1 + $0x3] ss:$4 sm:$0xff] %v1534_v44  ;;  %v1441_v44 = vadd.f32 %v1416_v34, %v2697_v36  ;;  %v1611_v36 = vrot.slane %v1539_v2, 2  ;;  %v1614_v39 = vrot.slane %v1540_v6, 2 }
 0x1ef   : > { %1697 = vst [vmem:[#allocation1 + $0x20] ss:$4 sm:$0xff] %v2704_v31  ;;  %v1417_v31 = vmul.f32 %v1392_v54, %v2730_v50 }
 0x1f0   : > { %1698 = vst [vmem:[#allocation1 + $0x21] ss:$4 sm:$0xff] %v1602_v21  ;;  %v1301_v22 = vpop.f32.mrf.mxu2  ;;  %v1466_v40 = vmul.f32 0.7978846, %v1441_v44 }
 0x1f1   : > { %1815 = vst [vmem:[%s2648_s10 + $0x20] sm:$0xff] %v1682_v0  ;;  %v2721_v53 = vadd.f32 %v2556_v11, %v1301_v22  ;;  %v1442_v13 = vadd.f32 %v1417_v31, %v2730_v50 }
 0x1f2   : > { %1818 = vst [vmem:[%s2648_s10 + $0x38] sm:$0x3f] %v1692_v3  ;;  %1981 = vtanh.f32 %v1466_v40  ;;  %v1609_v3 = vrot.slane %v2725_v43, 4 }
 0x1f3   : > { %1699 = vst [vmem:[#allocation1 + $0x22] ss:$4 sm:$0xff] %v1603_v27  ;;  %v1368_v1 = vmul.f32 0.044715, %v2721_v53 }
 0x1f5   : > { %v1691_v38 = vld.sshfl [vmem:[#allocation1] sm:$0xff pattern:$0x73625140]  ;;  %v1393_v51 = vmul.f32 %v1368_v1, %v2721_v53 }
 0x1f6   : > { %1693 = vst [vmem:[#allocation1] ss:$4 sm:$0xff] %v1535_v26  ;;  %v1467_v26 = vmul.f32 0.7978846, %v1442_v13 }
 0x1f7   : > { %1694 = vst [vmem:[#allocation1 + $0x1] ss:$4 sm:$0xff] %v1599_v42  ;;  %v1418_v47 = vmul.f32 %v1393_v51, %v2721_v53 }
 0x1f8   : > { %1695 = vst [vmem:[#allocation1 + $0x2] ss:$4 sm:$0xff] %v1600_v60  ;;  %v1982_v35 = vpop.eup %1981 }
 0x1f9   : > { %1696 = vst [vmem:[#allocation1 + $0x3] ss:$4 sm:$0xff] %v1601_v20  ;;  %v1443_v8 = vadd.f32 %v1418_v47, %v2721_v53  ;;  %v1516_v10 = vadd.f32 1.0, %v1982_v35  ;;  %v1615_v20 = vrot.slane %v1540_v6, 4 }
 0x1fa   : > { %1817 = vst [vmem:[%s2648_s10 + $0x30] sm:$0xff] %v1691_v38  ;;  %v1701_v28 = vld.sshfl [vmem:[#allocation1 + $0x20] sm:$0xff pattern:$0x73625140]  ;;  %v1343_v38 = vmul.f32 0.5, %v2721_v53 }
 0x1fb   : > { %1706 = vst [vmem:[#allocation1 + $0x20] ss:$4 sm:$0xff] %v1607_v49  ;;  %v1468_v0 = vmul.f32 0.7978846, %v1443_v8  ;;  %v1541_v21 = vmul.f32 %v1516_v10, %v1341_v33  ;;  %v1616_v49 = vrot.slane %v1540_v6, 6 }
 0x1fc   : > { %1707 = vst [vmem:[#allocation1 + $0x21] ss:$4 sm:$0xff] %v2725_v43 }
 0x1fd   : > { %1708 = vst [vmem:[#allocation1 + $0x22] ss:$4 sm:$0xff] %v1608_v41  ;;  %1983 = vtanh.f32 %v1468_v0  ;;  %v1617_v14 = vrot.slane %v1541_v21, 2  ;;  %v1618_v22 = vrot.slane %v1541_v21, 4  ;;  %v1619_v34 = vrot.slane %v1541_v21, 6 }
 0x1fe   : > { %1820 = vst [vmem:[%s2648_s10 + $0x48] sm:$0x3f] %v1701_v28  ;;  %1985 = vtanh.f32 %v1467_v26 }
 0x200   : > { %v1700_v59 = vld.sshfl [vmem:[#allocation1] sm:$0xff pattern:$0x73625140] }
 0x201   : > { %1702 = vst [vmem:[#allocation1] ss:$4 sm:$0xff] %v1604_v56  ;;  %v1304_v17 = vpop.f32.mrf.mxu2  ;;  %v1342_v56 = vmul.f32 0.5, %v2730_v50 }
 0x202   : > { %1703 = vst [vmem:[#allocation1 + $0x1] ss:$4 sm:$0xff] %v1537_v23  ;;  %v2745_v5 = vadd.f32 %v2556_v11, %v1304_v17 }
 0x203   : > { %1704 = vst [vmem:[#allocation1 + $0x2] ss:$4 sm:$0xff] %v1605_v61  ;;  %v1984_v29 = vpop.eup %1983 }
 0x204   : > { %1705 = vst [vmem:[#allocation1 + $0x3] ss:$4 sm:$0xff] %v1606_v62  ;;  %v1710_v48 = vld.sshfl [vmem:[#allocation1 + $0x20] sm:$0xff pattern:$0x73625140]  ;;  %v1518_v23 = vadd.f32 1.0, %v1984_v29  ;;  %v1986_v51 = vpop.eup %1985 }
 0x205   : > { %1819 = vst [vmem:[%s2648_s10 + $0x40] sm:$0xff] %v1700_v59  ;;  %v1369_v46 = vmul.f32 0.044715, %v2745_v5  ;;  %v1517_v52 = vadd.f32 1.0, %v1986_v51  ;;  %v1344_v8 = vmul.f32 0.5, %v2745_v5 }
 0x206   : > { %1715 = vst [vmem:[#allocation1 + $0x20] ss:$4 sm:$0xff] %v1612_v55  ;;  %v2767_v44 = vmul.f32 %v1518_v23, %v1343_v38 }
 0x207   : > { %1716 = vst [vmem:[#allocation1 + $0x21] ss:$4 sm:$0xff] %v1613_v4  ;;  %v1394_v12 = vmul.f32 %v1369_v46, %v2745_v5  ;;  %v1542_v54 = vmul.f32 %v1517_v52, %v1342_v56 }
 0x208   : > { %1717 = vst [vmem:[#allocation1 + $0x22] ss:$4 sm:$0xff] %v1540_v6  ;;  %v1623_v19 = vrot.slane %v2767_v44, 2  ;;  %v1624_v47 = vrot.slane %v2767_v44, 4 }
 0x209   : > { %1822 = vst [vmem:[%s2648_s10 + $0x58] sm:$0x3f] %v1710_v48  ;;  %v1419_v18 = vmul.f32 %v1394_v12, %v2745_v5  ;;  %v1306_v24 = vpop.f32.mrf.mxu2  ;;  %v1620_v6 = vrot.slane %v1542_v54, 2  ;;  %v1621_v0 = vrot.slane %v1542_v54, 4  ;;  %v1622_v10 = vrot.slane %v1542_v54, 6 }
 0x20a   : > { %v2759_v25 = vadd.f32 %v2556_v11, %v1306_v24 }
 0x20b   : > { %v1709_v15 = vld.sshfl [vmem:[#allocation1] sm:$0xff pattern:$0x73625140]  ;;  %v1444_v7 = vadd.f32 %v1419_v18, %v2745_v5 }
 0x20c   : > { %1821 = vst [vmem:[%s2648_s10 + $0x50] sm:$0xff] %v1709_v15  ;;  %v1370_v30 = vmul.f32 0.044715, %v2759_v25  ;;  %v1345_v50 = vmul.f32 0.5, %v2759_v25 }
 0x20d   : > { %1711 = vst [vmem:[#allocation1] ss:$4 sm:$0xff] %v1609_v3  ;;  %v1469_v32 = vmul.f32 0.7978846, %v1444_v7  ;;  %v1625_v7 = vrot.slane %v2767_v44, 6 }
 0x20e   : > { %1712 = vst [vmem:[#allocation1 + $0x1] ss:$4 sm:$0xff] %v1610_v57  ;;  %v1395_v42 = vmul.f32 %v1370_v30, %v2759_v25 }
 0x20f   : > { %1713 = vst [vmem:[#allocation1 + $0x2] ss:$4 sm:$0xff] %v1539_v2  ;;  %v1719_v27 = vld.sshfl [vmem:[#allocation1 + $0x20] sm:$0xff pattern:$0x73625140]  ;;  %1987 = vtanh.f32 %v1469_v32 }
 0x210   : > { %1714 = vst [vmem:[#allocation1 + $0x3] ss:$4 sm:$0xff] %v1611_v36  ;;  %v1420_v16 = vmul.f32 %v1395_v42, %v2759_v25 }
 0x211   : > { %1824 = vst [vmem:[%s2648_s10 + $0x68] sm:$0x3f] %v1719_v27 }
 0x212   : > { %1724 = vst [vmem:[#allocation1 + $0x20] ss:$4 sm:$0xff] %v1617_v14  ;;  %v1445_v60 = vadd.f32 %v1420_v16, %v2759_v25 }
 0x213   : > { %1725 = vst [vmem:[#allocation1 + $0x21] ss:$4 sm:$0xff] %v1618_v22 }
 0x214   : > { %1726 = vst [vmem:[#allocation1 + $0x22] ss:$4 sm:$0xff] %v1619_v34  ;;  %v1309_v1 = vpop.f32.mrf.mxu2  ;;  %v1470_v28 = vmul.f32 0.7978846, %v1445_v60 }
 0x215   : > { %v1310_v45 = vadd.f32 %v2556_v11, %v1309_v1  ;;  %v1988_v53 = vpop.eup %1987 }
 0x216   : > { %1989 = vtanh.f32 %v1470_v28  ;;  %v1519_v2 = vadd.f32 1.0, %v1988_v53 }
 0x217   : > { %v1718_v43 = vld.sshfl [vmem:[#allocation1] sm:$0xff pattern:$0x73625140]  ;;  %v1371_v41 = vmul.f32 0.044715, %v1310_v45  ;;  %v1346_v57 = vmul.f32 0.5, %v1310_v45 }
 0x218   : > { %1720 = vst [vmem:[#allocation1] ss:$4 sm:$0xff] %v1614_v39  ;;  %v1544_v17 = vmul.f32 %v1519_v2, %v1344_v8 }
 0x219   : > { %1721 = vst [vmem:[#allocation1 + $0x1] ss:$4 sm:$0xff] %v1615_v20  ;;  %v1396_v9 = vmul.f32 %v1371_v41, %v1310_v45 }
 0x21a   : > { %1722 = vst [vmem:[#allocation1 + $0x2] ss:$4 sm:$0xff] %v1616_v49  ;;  %v1628_v12 = vrot.slane %v1544_v17, 6  ;;  %v1626_v26 = vrot.slane %v1544_v17, 2  ;;  %v1627_v29 = vrot.slane %v1544_v17, 4 }
 0x21b   : > { %1823 = vst [vmem:[%s2648_s10 + $0x60] sm:$0xff] %v1718_v43  ;;  %v1728_v40 = vld.sshfl [vmem:[#allocation1 + $0x20] sm:$0xff pattern:$0x73625140]  ;;  %v1421_v58 = vmul.f32 %v1396_v9, %v1310_v45 }
 0x21c   : > { %1723 = vst [vmem:[#allocation1 + $0x3] ss:$4 sm:$0xff] %v1541_v21  ;;  %v1311_v59 = vpop.f32.mrf.mxu2  ;;  %v1990_v63 = vpop.eup %1989 }
 0x21d   : > { %1826 = vst [vmem:[%s2648_s10 + $0x78] sm:$0x3f] %v1728_v40  ;;  %v1446_v61 = vadd.f32 %v1421_v58, %v1310_v45  ;;  %v1312_v62 = vadd.f32 %v2556_v11, %v1311_v59  ;;  %v1520_v37 = vadd.f32 1.0, %v1990_v63 }
 0x21e   : > { %1733 = vst [vmem:[#allocation1 + $0x20] ss:$4 sm:$0xff] %v2767_v44 }
 0x21f   : > { %1734 = vst [vmem:[#allocation1 + $0x21] ss:$4 sm:$0xff] %v1623_v19  ;;  %v1471_v55 = vmul.f32 0.7978846, %v1446_v61  ;;  %v1372_v48 = vmul.f32 0.044715, %v1312_v62  ;;  %v1545_v31 = vmul.f32 %v1520_v37, %v1345_v50 }
 0x220   : > { %1735 = vst [vmem:[#allocation1 + $0x22] ss:$4 sm:$0xff] %v1624_v47  ;;  %v1347_v32 = vmul.f32 0.5, %v1312_v62 }
 0x221   : > { %1991 = vtanh.f32 %v1471_v55  ;;  %v1397_v4 = vmul.f32 %v1372_v48, %v1312_v62  ;;  %v1629_v13 = vrot.slane %v1545_v31, 2  ;;  %v1630_v44 = vrot.slane %v1545_v31, 4 }
 0x222   : > { %v1631_v45 = vrot.slane %v1545_v31, 6 }
 0x223   : > { %v1727_v35 = vld.sshfl [vmem:[#allocation1] sm:$0xff pattern:$0x73625140]  ;;  %v1422_v46 = vmul.f32 %v1397_v4, %v1312_v62 }
 0x224   : > { %1825 = vst [vmem:[%s2648_s10 + $0x70] sm:$0xff] %v1727_v35 }
 0x225   : > { %1729 = vst [vmem:[#allocation1] ss:$4 sm:$0xff] %v1542_v54  ;;  %v1447_v33 = vadd.f32 %v1422_v46, %v1312_v62 }
 0x226   : > { %1730 = vst [vmem:[#allocation1 + $0x1] ss:$4 sm:$0xff] %v1620_v6  ;;  %v2005_v6 = vld [vmem:[%s2804_s2] ss:$0 sm:$0xff] }
 0x227   : > { %1731 = vst [vmem:[#allocation1 + $0x2] ss:$4 sm:$0xff] %v1621_v0  ;;  %v1737_v5 = vld.sshfl [vmem:[#allocation1 + $0x20] sm:$0xff pattern:$0x73625140]  ;;  %v1992_v3 = vpop.eup %1991 }
 0x228   : > { %1732 = vst [vmem:[#allocation1 + $0x3] ss:$4 sm:$0xff] %v1622_v10  ;;  %v1472_v15 = vmul.f32 0.7978846, %v1447_v33  ;;  %v1521_v18 = vadd.f32 1.0, %v1992_v3 }
 0x229   : > { %1828 = vst [vmem:[%s2648_s10 + $0x88] sm:$0x3f] %v1737_v5 }
 0x22a   : > { %1742 = vst [vmem:[#allocation1 + $0x20] ss:$4 sm:$0xff] %v1628_v12  ;;  %1993 = vtanh.f32 %v1472_v15  ;;  %v1546_v25 = vmul.f32 %v1521_v18, %v1346_v57 }
 0x22b   : > { %1743 = vst [vmem:[#allocation1 + $0x21] ss:$4 sm:$0xff] %v1545_v31 }
 0x22c   : > { %1744 = vst [vmem:[#allocation1 + $0x22] ss:$4 sm:$0xff] %v1629_v13  ;;  %v1314_v21 = vpop.f32.mrf.mxu2  ;;  %v1633_v22 = vrot.slane %v1546_v25, 4  ;;  %v1634_v23 = vrot.slane %v1546_v25, 6  ;;  %v1632_v51 = vrot.slane %v1546_v25, 2 }
 0x22d   : > { %v1315_v24 = vadd.f32 %v2556_v11, %v1314_v21 }
 0x22f   : > { %v1736_v36 = vld.sshfl [vmem:[#allocation1] sm:$0xff pattern:$0x73625140]  ;;  %v1373_v27 = vmul.f32 0.044715, %v1315_v24  ;;  %v1348_v9 = vmul.f32 0.5, %v1315_v24 }
 0x230   : > { %1827 = vst [vmem:[%s2648_s10 + $0x80] sm:$0xff] %v1736_v36  ;;  %v1994_v14 = vpop.eup %1993 }
 0x231   : > { %1738 = vst [vmem:[#allocation1] ss:$4 sm:$0xff] %v1625_v7  ;;  %v1398_v30 = vmul.f32 %v1373_v27, %v1315_v24  ;;  %v1522_v34 = vadd.f32 1.0, %v1994_v14 }
 0x232   : > { %1739 = vst [vmem:[#allocation1 + $0x1] ss:$4 sm:$0xff] %v1544_v17 }
 0x233   : > { %1740 = vst [vmem:[#allocation1 + $0x2] ss:$4 sm:$0xff] %v1626_v26  ;;  %v1746_v42 = vld.sshfl [vmem:[#allocation1 + $0x20] sm:$0xff pattern:$0x73625140]  ;;  %v1423_v16 = vmul.f32 %v1398_v30, %v1315_v24  ;;  %v1547_v38 = vmul.f32 %v1522_v34, %v1347_v32 }
 0x234   : > { %1741 = vst [vmem:[#allocation1 + $0x3] ss:$4 sm:$0xff] %v1627_v29  ;;  %v1316_v60 = vpop.f32.mrf.mxu2 }
 0x235   : > { %1830 = vst [vmem:[%s2648_s10 + $0x98] sm:$0x3f] %v1746_v42  ;;  %v1448_v39 = vadd.f32 %v1423_v16, %v1315_v24  ;;  %v1317_v1 = vadd.f32 %v2556_v11, %v1316_v60  ;;  %v1635_v61 = vrot.slane %v1547_v38, 2  ;;  %v1636_v63 = vrot.slane %v1547_v38, 4 }
 0x236   : > { %1751 = vst [vmem:[#allocation1 + $0x20] ss:$4 sm:$0xff] %v1633_v22  ;;  %v1637_v8 = vrot.slane %v1547_v38, 6 }
 0x237   : > { %1752 = vst [vmem:[#allocation1 + $0x21] ss:$4 sm:$0xff] %v1634_v23  ;;  %v1473_v20 = vmul.f32 0.7978846, %v1448_v39  ;;  %v1374_v43 = vmul.f32 0.044715, %v1317_v1 }
 0x238   : > { %1753 = vst [vmem:[#allocation1 + $0x22] ss:$4 sm:$0xff] %v1547_v38 }
 0x239   : > { %1995 = vtanh.f32 %v1473_v20  ;;  %v1399_v49 = vmul.f32 %v1374_v43, %v1317_v1 }
 0x23b   : > { %v1745_v28 = vld.sshfl [vmem:[#allocation1] sm:$0xff pattern:$0x73625140]  ;;  %v1424_v41 = vmul.f32 %v1399_v49, %v1317_v1 }
 0x23c   : > { %1829 = vst [vmem:[%s2648_s10 + $0x90] sm:$0xff] %v1745_v28 }
 0x23d   : > { %1747 = vst [vmem:[#allocation1] ss:$4 sm:$0xff] %v1630_v44  ;;  %v1449_v53 = vadd.f32 %v1424_v41, %v1317_v1 }
 0x23e   : > { %1748 = vst [vmem:[#allocation1 + $0x1] ss:$4 sm:$0xff] %v1631_v45 }
 0x23f   : > { %v1996_v40 = vpop.eup %1995  ;;  %1749 = vst [vmem:[#allocation1 + $0x2] ss:$4 sm:$0xff] %v1546_v25  ;;  %v1755_v19 = vld.sshfl [vmem:[#allocation1 + $0x20] sm:$0xff pattern:$0x73625140] }
 0x240   : > { %1750 = vst [vmem:[#allocation1 + $0x3] ss:$4 sm:$0xff] %v1632_v51  ;;  %v1523_v52 = vadd.f32 1.0, %v1996_v40  ;;  %v1474_v47 = vmul.f32 0.7978846, %v1449_v53 }
 0x241   : > { %1832 = vst [vmem:[%s2648_s10 + $0xa8] sm:$0x3f] %v1755_v19 }
 0x242   : > { %v1548_v58 = vmul.f32 %v1523_v52, %v1348_v9  ;;  %1997 = vtanh.f32 %v1474_v47 }
 0x244   : > { %v1638_v56 = vrot.slane %v1548_v58, 2  ;;  %v1639_v2 = vrot.slane %v1548_v58, 4  ;;  %v1319_v59 = vpop.f32.mrf.mxu3  ;;  %v1640_v48 = vrot.slane %v1548_v58, 6 }
 0x245   : > { %v1320_v62 = vadd.f32 %v2556_v11, %v1319_v59  ;;  %v1349_v11 = vmul.f32 0.5, %v1317_v1 }
 0x246   : > { %1760 = vst [vmem:[#allocation1 + $0x20] ss:$4 sm:$0xff] %v1638_v56 }
 0x247   : > { %v1754_v54 = vld.sshfl [vmem:[#allocation1] sm:$0xff pattern:$0x73625140]  ;;  %1761 = vst [vmem:[#allocation1 + $0x21] ss:$4 sm:$0xff] %v1639_v2  ;;  %v1350_v27 = vmul.f32 0.5, %v1320_v62 }
 0x248   : > { %v1998_v37 = vpop.eup %1997  ;;  %1831 = vst [vmem:[%s2648_s10 + $0xa0] sm:$0xff] %v1754_v54  ;;  %v1375_v55 = vmul.f32 0.044715, %v1320_v62 }
 0x249   : > { %1756 = vst [vmem:[#allocation1] ss:$4 sm:$0xff] %v1635_v61  ;;  %v1524_v50 = vadd.f32 1.0, %v1998_v37 }
 0x24a   : > { %1757 = vst [vmem:[#allocation1 + $0x1] ss:$4 sm:$0xff] %v1636_v63  ;;  %v1400_v17 = vmul.f32 %v1375_v55, %v1320_v62 }
 0x24b   : > { %1758 = vst [vmem:[#allocation1 + $0x2] ss:$4 sm:$0xff] %v1637_v8  ;;  %v1549_v46 = vmul.f32 %v1524_v50, %v1349_v11 }
 0x24c   : > { %1759 = vst [vmem:[#allocation1 + $0x3] ss:$4 sm:$0xff] %v1548_v58  ;;  %v1425_v35 = vmul.f32 %v1400_v17, %v1320_v62  ;;  %v1321_v4 = vpop.f32.mrf.mxu3 }
 0x24d   : > { %1762 = vst [vmem:[#allocation1 + $0x22] ss:$4 sm:$0xff] %v1640_v48  ;;  %v1322_v31 = vadd.f32 %v2005_v6, %v1321_v4  ;;  %v1641_v13 = vrot.slane %v1549_v46, 2  ;;  %v1642_v18 = vrot.slane %v1549_v46, 4  ;;  %v1643_v21 = vrot.slane %v1549_v46, 6 }
 0x24e   : > { %v1450_v0 = vadd.f32 %v1425_v35, %v1320_v62 }
 0x24f   : > { %v1376_v10 = vmul.f32 0.044715, %v1322_v31  ;;  %v1351_v39 = vmul.f32 0.5, %v1322_v31 }
 0x250   : > { %v1475_v12 = vmul.f32 0.7978846, %v1450_v0 }
 0x251   : > { %v1401_v5 = vmul.f32 %v1376_v10, %v1322_v31 }
 0x252   : > { %1999 = vtanh.f32 %v1475_v12 }
 0x253   : > { %v1763_v33 = vld.sshfl [vmem:[#allocation1] sm:$0xff pattern:$0x73625140]  ;;  %v1426_v3 = vmul.f32 %v1401_v5, %v1322_v31 }
 0x254   : > { %v1764_v15 = vld.sshfl [vmem:[#allocation1 + $0x20] sm:$0xff pattern:$0x73625140]  ;;  %1833 = vst [vmem:[%s2648_s10 + $0xb0] sm:$0xff] %v1763_v33  ;;  %v1324_v57 = vpop.f32.mrf.mxu3 }
 0x255   : > { %1834 = vst [vmem:[%s2648_s10 + $0xb8] sm:$0x3f] %v1764_v15  ;;  %v1451_v24 = vadd.f32 %v1426_v3, %v1322_v31  ;;  %v1325_v7 = vadd.f32 %v2005_v6, %v1324_v57 }
 0x256   : > { %1765 = vst [vmem:[#allocation1] ss:$4 sm:$0xff] %v1549_v46 }
 0x257   : > { %1766 = vst [vmem:[#allocation1 + $0x1] ss:$4 sm:$0xff] %v1641_v13  ;;  %v1476_v25 = vmul.f32 0.7978846, %v1451_v24  ;;  %v1377_v26 = vmul.f32 0.044715, %v1325_v7 }
 0x258   : > { %v2000_v36 = vpop.eup %1999  ;;  %1767 = vst [vmem:[#allocation1 + $0x2] ss:$4 sm:$0xff] %v1642_v18  ;;  %v1352_v41 = vmul.f32 0.5, %v1325_v7 }
 0x259   : > { %1768 = vst [vmem:[#allocation1 + $0x3] ss:$4 sm:$0xff] %v1643_v21  ;;  %v1525_v29 = vadd.f32 1.0, %v2000_v36  ;;  %2001 = vtanh.f32 %v1476_v25  ;;  %v1402_v14 = vmul.f32 %v1377_v26, %v1325_v7 }
 0x25b   : > { %v1550_v30 = vmul.f32 %v1525_v29, %v1350_v27  ;;  %v1427_v22 = vmul.f32 %v1402_v14, %v1325_v7 }
 0x25c   : > { %v1326_v32 = vpop.f32.mrf.mxu3 }
 0x25d   : > { %v1644_v34 = vrot.slane %v1550_v30, 2  ;;  %v1645_v42 = vrot.slane %v1550_v30, 4  ;;  %1769 = vst [vmem:[#allocation1 + $0x20] ss:$4 sm:$0xff] %v1550_v30  ;;  %v1646_v23 = vrot.slane %v1550_v30, 6  ;;  %v1452_v16 = vadd.f32 %v1427_v22, %v1325_v7 }
 0x25f   : > { %v2002_v38 = vpop.eup %2001  ;;  %1770 = vst [vmem:[#allocation1 + $0x21] ss:$4 sm:$0xff] %v1644_v34  ;;  %v1477_v20 = vmul.f32 0.7978846, %v1452_v16 }
 0x260   : > { %v1772_v60 = vld.sshfl [vmem:[#allocation1] sm:$0xff pattern:$0x73625140]  ;;  %1771 = vst [vmem:[#allocation1 + $0x22] ss:$4 sm:$0xff] %v1645_v42  ;;  %v1526_v1 = vadd.f32 1.0, %v2002_v38 }
 0x261   : > { %1835 = vst [vmem:[%s2648_s10 + $0xc0] sm:$0xff] %v1772_v60  ;;  %2003 = vtanh.f32 %v1477_v20 }
 0x262   : > { %1774 = vst [vmem:[#allocation1] ss:$4 sm:$0xff] %v1646_v23  ;;  %v1551_v43 = vmul.f32 %v1526_v1, %v1351_v39 }
 0x264   : > { %v1647_v44 = vrot.slane %v1551_v43, 2  ;;  %v1648_v45 = vrot.slane %v1551_v43, 4  ;;  %1775 = vst [vmem:[#allocation1 + $0x1] ss:$4 sm:$0xff] %v1551_v43  ;;  %v1649_v49 = vrot.slane %v1551_v43, 6 }
 0x266   : > { %1776 = vst [vmem:[#allocation1 + $0x2] ss:$4 sm:$0xff] %v1647_v44 }
 0x267   : > { %v1773_v28 = vld.sshfl [vmem:[#allocation1 + $0x20] sm:$0xff pattern:$0x73625140]  ;;  %1777 = vst [vmem:[#allocation1 + $0x3] ss:$4 sm:$0xff] %v1648_v45  ;;  %v2004_v51 = vpop.eup %2003 }
 0x268   : > { %1836 = vst [vmem:[%s2648_s10 + $0xc8] sm:$0x3f] %v1773_v28  ;;  %v1527_v53 = vadd.f32 1.0, %v2004_v51 }
 0x269   : > { %1778 = vst [vmem:[#allocation1 + $0x20] ss:$4 sm:$0xff] %v1649_v49 }
 0x26a   : > { %v1552_v40 = vmul.f32 %v1527_v53, %v1352_v41 }
 0x26c   : > { %v1650_v9 = vrot.slane %v1552_v40, 2  ;;  %1779 = vst [vmem:[#allocation1 + $0x21] ss:$4 sm:$0xff] %v1552_v40 }
 0x26e   : > { %v1781_v19 = vld.sshfl [vmem:[#allocation1] sm:$0xff pattern:$0x73625140]  ;;  %1780 = vst [vmem:[#allocation1 + $0x22] ss:$4 sm:$0xff] %v1650_v9 }
 0x26f   : > { %1837 = vst [vmem:[%s2648_s10 + $0xd0] sm:$0xff] %v1781_v19 }
 0x275   : > { %v1782_v52 = vld.sshfl [vmem:[#allocation1 + $0x20] sm:$0xff pattern:$0x73625140] }
 0x276   : > { %1838 = vst [vmem:[%s2648_s10 + $0xd8] sm:$0x3f] %v1782_v52 }
 0x277 PF: > { %s13_s12 = sadd.s32 1, %s2012_s12  }
 0x278   : > { %p10_p4 = scmp.ge.s32.totalorder %s13_s12, 4  }
 0x27a   :  { %12 = sbr.rel (!%p10_p4) target bundleno = 1 (0x1), region = 75 }

</bundles_post_ra>
